<compile_context>
chip_gen: v6e
topology: v6e:2x2x1
jax: 0.10.0
libtpu: 0.0.40
codegen_flags: <defaults>
</compile_context>

<pallas_src>
import math

import jax
import jax.numpy as jnp
from jax.experimental import pallas as pl
from jax.experimental.pallas import tpu as pltpu


def _softplus(x):
    # matches torch.nn.Softplus(beta=1, threshold=20)
    return jnp.where(x > 20.0, x, jnp.log1p(jnp.exp(jnp.minimum(x, 20.0))))


def _round_up(n, m):
    return ((n + m - 1) // m) * m


def r_sep_nam_kernel(x_ref,
                     w1m_ref, b1m_ref, w2m_ref, b2m_ref, w3m_ref, mub_ref,
                     w1t_ref, b1t_ref, w2t_ref, taub_ref,
                     mu_ref, tau_ref):
    """One batch tile, batch along lanes.

    x_ref   : (n_blocks, Bt)                    input, batch in lanes
    w1m_ref : (n_blocks*H_mu0, n_blocks)        block-diag layer-1 mu weight
    b1m_ref : (n_blocks*H_mu0, 1)
    w2m_ref : (n_blocks*H_mu1, n_blocks*H_mu0)  block-diag layer-2 mu weight
    b2m_ref : (n_blocks*H_mu1, 1)
    w3m_ref : (1, n_blocks*H_mu1)               layer-3 mu weight, lr head folded in
    mub_ref : (1, 1)                            folded bias: sum_j b3m[j]*wlr[j] + blr
    w1t_ref : (n_blocks*H_tau0, n_blocks)       block-diag layer-1 tau weight
    b1t_ref : (n_blocks*H_tau0, 1)
    w2t_ref : (1, n_blocks*H_tau0)              layer-2 tau weight, lr head folded in
    taub_ref: (1, 1)                            folded bias: sum_j b2t[j]*wlr[j] + blr
    mu_ref  : (1, Bt)                           lane-dense outputs
    tau_ref : (1, Bt)
    """
    x = x_ref[...]                                                     # (n_blocks, Bt)

    # ---- mu path: BlockLinear(1->H0) + ReLU + BlockLinear(H0->H1) + [Dropout=id] + ReLU
    #               + BlockLinear(H1->1) with shared lr head folded into w3m/mub.
    h1 = jnp.dot(w1m_ref[...], x, preferred_element_type=jnp.float32) + b1m_ref[...]
    h1 = jnp.maximum(h1, 0.0)                                          # (nb*H0, Bt)
    h2 = jnp.dot(w2m_ref[...], h1, preferred_element_type=jnp.float32) + b2m_ref[...]
    h2 = jnp.maximum(h2, 0.0)                                          # (nb*H1, Bt)
    mu_ref[...] = (jnp.dot(w3m_ref[...], h2, preferred_element_type=jnp.float32)
                   + mub_ref[...])                                     # (1, Bt)

    # ---- tau path: BlockLinear(1->H0) + Softplus + [Dropout=id] + BlockLinear(H0->1)
    #                with shared lr head folded into w2t/taub.
    t1 = jnp.dot(w1t_ref[...], x, preferred_element_type=jnp.float32) + b1t_ref[...]
    t1 = _softplus(t1)                                                 # (nb*Ht0, Bt)
    tau_ref[...] = (jnp.dot(w2t_ref[...], t1, preferred_element_type=jnp.float32)
                    + taub_ref[...])                                   # (1, Bt)


def _pack_params(params, n_blocks, H_mu, H_tau):
    """Build block-diagonal weights and fold the lr head into the last layers."""
    w1m, b1m, w2m, b2m, w3m, b3m, w1t, b1t, w2t, b2t, wlr, blr = params
    H0, H1 = H_mu
    Ht0 = H_tau[0]
    eye = jnp.eye(n_blocks, dtype=jnp.float32)

    # mu path
    w1m_bd = (w1m[:, :, None] * eye[:, None, :]).reshape(n_blocks * H0, n_blocks)
    b1m_col = b1m.reshape(n_blocks * H0, 1)
    w2m_bd = (eye[:, None, :, None] * w2m[:, :, None, :]).reshape(n_blocks * H1,
                                                                  n_blocks * H0)
    b2m_col = b2m.reshape(n_blocks * H1, 1)
    w3m_row = (w3m * wlr).reshape(1, n_blocks * H1)          # lr head folded in
    mu_bias = (jnp.sum(b3m * wlr) + blr[0, 0]).reshape(1, 1)

    # tau path
    w1t_bd = (w1t[:, :, None] * eye[:, None, :]).reshape(n_blocks * Ht0, n_blocks)
    b1t_col = b1t.reshape(n_blocks * Ht0, 1)
    w2t_row = (w2t * wlr).reshape(1, n_blocks * Ht0)         # lr head folded in
    tau_bias = (jnp.sum(b2t * wlr) + blr[0, 0]).reshape(1, 1)

    return [w1m_bd, b1m_col, w2m_bd, b2m_col, w3m_row, mu_bias,
            w1t_bd, b1t_col, w2t_row, tau_bias]


def r_sep_nam(x, params, n_blocks, H_mu, H_tau, *, b_tile=512):
    """params = [w1m, b1m, w2m(out,in), b2m, w3m, b3m, w1t, b1t, w2t, b2t, wlr, blr]."""
    B = x.shape[0]
    assert x.shape[1] == n_blocks

    packed = _pack_params(params, n_blocks, H_mu, H_tau)

    # tile the batch along lanes; pad B up to a multiple of the tile
    bt = min(b_tile, _round_up(B, 128))
    Bp = _round_up(B, bt)
    x_t = jnp.zeros((n_blocks, Bp), jnp.float32).at[:, :B].set(x.T.astype(jnp.float32))

    def full_spec(arr):
        return pl.BlockSpec(arr.shape, lambda i: (0, 0))

    in_specs = ([pl.BlockSpec((n_blocks, bt), lambda i: (0, i))]
                + [full_spec(p) for p in packed])
    out_specs = (pl.BlockSpec((1, bt), lambda i: (0, i)),
                 pl.BlockSpec((1, bt), lambda i: (0, i)))
    out_shape = (jax.ShapeDtypeStruct((1, Bp), jnp.float32),
                 jax.ShapeDtypeStruct((1, Bp), jnp.float32))

    mu_row, tau_row = pl.pallas_call(
        r_sep_nam_kernel,
        grid=(Bp // bt,),
        in_specs=in_specs,
        out_specs=out_specs,
        out_shape=out_shape,
        compiler_params=pltpu.CompilerParams(
            dimension_semantics=("parallel",),
            vmem_limit_bytes=32 * 1024 * 1024,   # headroom for large tiles (v5e default is 16 MiB)
        ),
    )(x_t, *packed)

    # lane-dense (1, Bp) rows -> (B, 1) columns (layout plumbing in the wrapper)
    return mu_row[0, :B].reshape(B, 1), tau_row[0, :B].reshape(B, 1)


def init_params(key, n_blocks, H_mu, H_tau, D_out=1):
    assert D_out == 1, "shared lr head requires D_out == 1 (see module analysis)"
    ks = jax.random.split(key, 12)

    def kaiming(k, shape, fan_in):
        bound = math.sqrt(6.0 / fan_in)
        return jax.random.uniform(k, shape, jnp.float32, -bound, bound)

    def bias_init(k, shape, fan_in):
        bound = 1.0 / math.sqrt(fan_in)
        return jax.random.uniform(k, shape, jnp.float32, -bound, bound)

    w1m = kaiming(ks[0], (n_blocks, H_mu[0]), 1)
    b1m = bias_init(ks[1], (n_blocks, H_mu[0]), 1)
    w2m = kaiming(ks[2], (n_blocks, H_mu[1], H_mu[0]), H_mu[0])   # (out, in) per block
    b2m = bias_init(ks[3], (n_blocks, H_mu[1]), H_mu[0])
    w3m = kaiming(ks[4], (n_blocks, H_mu[1]), H_mu[1])
    b3m = bias_init(ks[5], (n_blocks, 1), H_mu[1])
    w1t = kaiming(ks[6], (n_blocks, H_tau[0]), 1)
    b1t = bias_init(ks[7], (n_blocks, H_tau[0]), 1)
    w2t = kaiming(ks[8], (n_blocks, H_tau[0]), H_tau[0])
    b2t = bias_init(ks[9], (n_blocks, 1), H_tau[0])
    wlr = kaiming(ks[10], (n_blocks, 1), n_blocks)                # Linear(n_blocks, 1) weight as column
    blr = bias_init(ks[11], (1, 1), n_blocks)
    return [w1m, b1m, w2m, b2m, w3m, b3m, w1t, b1t, w2t, b2t, wlr, blr]


def reference(x, params):
    """Pure-JAX reference mirroring the PyTorch forward (eval mode)."""
    w1m, b1m, w2m, b2m, w3m, b3m, w1t, b1t, w2t, b2t, wlr, blr = params
    n_blocks = x.shape[1]
    mus, taus = [], []
    for j in range(n_blocks):
        xj = x[:, j:j + 1]
        h1 = jnp.maximum(xj * w1m[j] + b1m[j], 0.0)
        h2 = jnp.maximum(h1 @ w2m[j].T + b2m[j], 0.0)
        mus.append(h2 @ w3m[j][:, None] + b3m[j])
        t1 = _softplus(xj * w1t[j] + b1t[j])
        taus.append(t1 @ w2t[j][:, None] + b2t[j])
    mu = jnp.concatenate(mus, axis=1)    # (B, n_blocks)
    tau = jnp.concatenate(taus, axis=1)  # (B, n_blocks)
    return mu @ wlr + blr, tau @ wlr + blr


if __name__ == "__main__":
    # n_blocks * H_mu = 128 -> layer-2 mu matmul is one full 128-K MXU tile.
    # B=1024 with b_tile=512 -> 2 parallel grid steps (both v7x TensorCores busy).
    B, n_blocks = 1024, 4
    H_mu, H_tau, D_out = [32, 32], [16], 1

    key = jax.random.PRNGKey(0)
    kx, kp = jax.random.split(key)
    x = jax.random.normal(kx, (B, n_blocks), jnp.float32)
    params = init_params(kp, n_blocks, H_mu, H_tau, D_out)

    mu_out, tau_out = jax.block_until_ready(
        r_sep_nam(x, params, n_blocks, H_mu, H_tau, b_tile=512))
    mu_ref, tau_ref = reference(x, params)

    assert mu_out.shape == (B, D_out) and tau_out.shape == (B, D_out)
    # lr-head folding reorders the float sums slightly -> allow a small tolerance
    assert jnp.allclose(mu_out, mu_ref, rtol=1e-4, atol=1e-4)
    assert jnp.allclose(tau_out, tau_ref, rtol=1e-4, atol=1e-4)
    print("KERNEL_OK")
</pallas_src>

<mosaic_0001>
module attributes {stable_mosaic.version = 11 : i64} {
  func.func @r_sep_nam_kernel(%arg0: i32, %arg1: memref<4x512xf32, #tpu.memory_space<vmem>>, %arg2: memref<128x4xf32, #tpu.memory_space<vmem>>, %arg3: memref<128x1xf32, #tpu.memory_space<vmem>>, %arg4: memref<128x128xf32, #tpu.memory_space<vmem>>, %arg5: memref<128x1xf32, #tpu.memory_space<vmem>>, %arg6: memref<1x128xf32, #tpu.memory_space<vmem>>, %arg7: memref<1x1xf32, #tpu.memory_space<vmem>>, %arg8: memref<64x4xf32, #tpu.memory_space<vmem>>, %arg9: memref<64x1xf32, #tpu.memory_space<vmem>>, %arg10: memref<1x64xf32, #tpu.memory_space<vmem>>, %arg11: memref<1x1xf32, #tpu.memory_space<vmem>>, %arg12: memref<1x512xf32, #tpu.memory_space<vmem>>, %arg13: memref<1x512xf32, #tpu.memory_space<vmem>>) attributes {dimension_semantics = [#tpu.dimension_semantics<parallel>], iteration_bounds = array<i64: 2>, scalar_prefetch = 0 : i64, scratch_operands = 0 : i64, tpu.core_type = #tpu.core_type<tc>, window_params = [{transform_indices = @transform_0, window_bounds = array<i64: 4, 512>}, {pipeline_mode = #tpu.pipeline_mode<synchronous>, transform_indices = @transform_1, window_bounds = array<i64: 128, 4>}, {pipeline_mode = #tpu.pipeline_mode<synchronous>, transform_indices = @transform_2, window_bounds = array<i64: 128, 1>}, {pipeline_mode = #tpu.pipeline_mode<synchronous>, transform_indices = @transform_3, window_bounds = array<i64: 128, 128>}, {pipeline_mode = #tpu.pipeline_mode<synchronous>, transform_indices = @transform_4, window_bounds = array<i64: 128, 1>}, {pipeline_mode = #tpu.pipeline_mode<synchronous>, transform_indices = @transform_5, window_bounds = array<i64: 1, 128>}, {pipeline_mode = #tpu.pipeline_mode<synchronous>, transform_indices = @transform_6, window_bounds = array<i64: 1, 1>}, {pipeline_mode = #tpu.pipeline_mode<synchronous>, transform_indices = @transform_7, window_bounds = array<i64: 64, 4>}, {pipeline_mode = #tpu.pipeline_mode<synchronous>, transform_indices = @transform_8, window_bounds = array<i64: 64, 1>}, {pipeline_mode = #tpu.pipeline_mode<synchronous>, transform_indices = @transform_9, window_bounds = array<i64: 1, 64>}, {pipeline_mode = #tpu.pipeline_mode<synchronous>, transform_indices = @transform_10, window_bounds = array<i64: 1, 1>}, {transform_indices = @transform_11, window_bounds = array<i64: 1, 512>}, {transform_indices = @transform_12, window_bounds = array<i64: 1, 512>}]} {
    %c0 = arith.constant 0 : index
    %c0_0 = arith.constant 0 : index
    %0 = vector.load %arg1[%c0, %c0_0] : memref<4x512xf32, #tpu.memory_space<vmem>>, vector<4x512xf32>
    %c0_1 = arith.constant 0 : index
    %c0_2 = arith.constant 0 : index
    %1 = vector.load %arg2[%c0_1, %c0_2] : memref<128x4xf32, #tpu.memory_space<vmem>>, vector<128x4xf32>
    %cst = arith.constant dense<0.000000e+00> : vector<128x512xf32>
    %2 = tpu.matmul %1, %0, %cst {dimension_numbers = #tpu.dot_dimension_numbers<[1], [0], [0], [1], [0, 0, 1, 1], [], []>} : vector<128x4xf32>, vector<4x512xf32>, vector<128x512xf32> -> vector<128x512xf32>
    %c0_3 = arith.constant 0 : index
    %c0_4 = arith.constant 0 : index
    %3 = vector.load %arg3[%c0_3, %c0_4] : memref<128x1xf32, #tpu.memory_space<vmem>>, vector<128x1xf32>
    %4 = vector.broadcast %3 : vector<128x1xf32> to vector<128x512xf32>
    %5 = arith.addf %2, %4 : vector<128x512xf32>
    %cst_5 = arith.constant 0.000000e+00 : f32
    %6 = vector.broadcast %cst_5 : f32 to vector<128x512xf32>
    %7 = arith.maximumf %5, %6 : vector<128x512xf32>
    %c0_6 = arith.constant 0 : index
    %c0_7 = arith.constant 0 : index
    %8 = vector.load %arg4[%c0_6, %c0_7] : memref<128x128xf32, #tpu.memory_space<vmem>>, vector<128x128xf32>
    %cst_8 = arith.constant dense<0.000000e+00> : vector<128x512xf32>
    %9 = tpu.matmul %8, %7, %cst_8 {dimension_numbers = #tpu.dot_dimension_numbers<[1], [0], [0], [1], [0, 0, 1, 1], [], []>} : vector<128x128xf32>, vector<128x512xf32>, vector<128x512xf32> -> vector<128x512xf32>
    %c0_9 = arith.constant 0 : index
    %c0_10 = arith.constant 0 : index
    %10 = vector.load %arg5[%c0_9, %c0_10] : memref<128x1xf32, #tpu.memory_space<vmem>>, vector<128x1xf32>
    %11 = vector.broadcast %10 : vector<128x1xf32> to vector<128x512xf32>
    %12 = arith.addf %9, %11 : vector<128x512xf32>
    %cst_11 = arith.constant 0.000000e+00 : f32
    %13 = vector.broadcast %cst_11 : f32 to vector<128x512xf32>
    %14 = arith.maximumf %12, %13 : vector<128x512xf32>
    %c0_12 = arith.constant 0 : index
    %c0_13 = arith.constant 0 : index
    %15 = vector.load %arg6[%c0_12, %c0_13] : memref<1x128xf32, #tpu.memory_space<vmem>>, vector<1x128xf32>
    %cst_14 = arith.constant dense<0.000000e+00> : vector<1x512xf32>
    %16 = tpu.matmul %15, %14, %cst_14 {dimension_numbers = #tpu.dot_dimension_numbers<[1], [0], [0], [1], [0, 0, 1, 1], [], []>} : vector<1x128xf32>, vector<128x512xf32>, vector<1x512xf32> -> vector<1x512xf32>
    %c0_15 = arith.constant 0 : index
    %c0_16 = arith.constant 0 : index
    %17 = vector.load %arg7[%c0_15, %c0_16] : memref<1x1xf32, #tpu.memory_space<vmem>>, vector<1x1xf32>
    %18 = vector.broadcast %17 : vector<1x1xf32> to vector<1x512xf32>
    %19 = arith.addf %16, %18 : vector<1x512xf32>
    %c0_17 = arith.constant 0 : index
    %c0_18 = arith.constant 0 : index
    %20 = vector.load %arg12[%c0_17, %c0_18] : memref<1x512xf32, #tpu.memory_space<vmem>>, vector<1x512xf32>
    tpu.vector_store %arg12[%c0_17, %c0_18], %19 {strides = array<i32>} : memref<1x512xf32, #tpu.memory_space<vmem>>, vector<1x512xf32>,
    %c0_19 = arith.constant 0 : index
    %c0_20 = arith.constant 0 : index
    %21 = vector.load %arg8[%c0_19, %c0_20] : memref<64x4xf32, #tpu.memory_space<vmem>>, vector<64x4xf32>
    %cst_21 = arith.constant dense<0.000000e+00> : vector<64x512xf32>
    %22 = tpu.matmul %21, %0, %cst_21 {dimension_numbers = #tpu.dot_dimension_numbers<[1], [0], [0], [1], [0, 0, 1, 1], [], []>} : vector<64x4xf32>, vector<4x512xf32>, vector<64x512xf32> -> vector<64x512xf32>
    %c0_22 = arith.constant 0 : index
    %c0_23 = arith.constant 0 : index
    %23 = vector.load %arg9[%c0_22, %c0_23] : memref<64x1xf32, #tpu.memory_space<vmem>>, vector<64x1xf32>
    %24 = vector.broadcast %23 : vector<64x1xf32> to vector<64x512xf32>
    %25 = arith.addf %22, %24 : vector<64x512xf32>
    %cst_24 = arith.constant 2.000000e+01 : f32
    %26 = vector.broadcast %cst_24 : f32 to vector<64x512xf32>
    %27 = arith.cmpf ogt, %25, %26 : vector<64x512xf32>
    %cst_25 = arith.constant 2.000000e+01 : f32
    %28 = vector.broadcast %cst_25 : f32 to vector<64x512xf32>
    %29 = arith.minimumf %25, %28 : vector<64x512xf32>
    %30 = math.exp %29 : vector<64x512xf32>
    %31 = math.log1p %30 : vector<64x512xf32>
    %32 = arith.select %27, %25, %31 : vector<64x512xi1>, vector<64x512xf32>
    %c0_26 = arith.constant 0 : index
    %c0_27 = arith.constant 0 : index
    %33 = vector.load %arg10[%c0_26, %c0_27] : memref<1x64xf32, #tpu.memory_space<vmem>>, vector<1x64xf32>
    %cst_28 = arith.constant dense<0.000000e+00> : vector<1x512xf32>
    %34 = tpu.matmul %33, %32, %cst_28 {dimension_numbers = #tpu.dot_dimension_numbers<[1], [0], [0], [1], [0, 0, 1, 1], [], []>} : vector<1x64xf32>, vector<64x512xf32>, vector<1x512xf32> -> vector<1x512xf32>
    %c0_29 = arith.constant 0 : index
    %c0_30 = arith.constant 0 : index
    %35 = vector.load %arg11[%c0_29, %c0_30] : memref<1x1xf32, #tpu.memory_space<vmem>>, vector<1x1xf32>
    %36 = vector.broadcast %35 : vector<1x1xf32> to vector<1x512xf32>
    %37 = arith.addf %34, %36 : vector<1x512xf32>
    %c0_31 = arith.constant 0 : index
    %c0_32 = arith.constant 0 : index
    %38 = vector.load %arg13[%c0_31, %c0_32] : memref<1x512xf32, #tpu.memory_space<vmem>>, vector<1x512xf32>
    tpu.vector_store %arg13[%c0_31, %c0_32], %37 {strides = array<i32>} : memref<1x512xf32, #tpu.memory_space<vmem>>, vector<1x512xf32>,
    return
  }
  func.func @transform_0(%arg0: i32) -> (i32, i32) {
    %c0_i32 = arith.constant 0 : i32
    %c0_i32_0 = arith.constant 0 : i32
    return %c0_i32, %arg0 : i32, i32
  }
  func.func @transform_1(%arg0: i32) -> (i32, i32) {
    %c0_i32 = arith.constant 0 : i32
    %c0_i32_0 = arith.constant 0 : i32
    %c0_i32_1 = arith.constant 0 : i32
    return %c0_i32, %c0_i32_0 : i32, i32
  }
  func.func @transform_2(%arg0: i32) -> (i32, i32) {
    %c0_i32 = arith.constant 0 : i32
    %c0_i32_0 = arith.constant 0 : i32
    %c0_i32_1 = arith.constant 0 : i32
    return %c0_i32, %c0_i32_0 : i32, i32
  }
  func.func @transform_3(%arg0: i32) -> (i32, i32) {
    %c0_i32 = arith.constant 0 : i32
    %c0_i32_0 = arith.constant 0 : i32
    %c0_i32_1 = arith.constant 0 : i32
    return %c0_i32, %c0_i32_0 : i32, i32
  }
  func.func @transform_4(%arg0: i32) -> (i32, i32) {
    %c0_i32 = arith.constant 0 : i32
    %c0_i32_0 = arith.constant 0 : i32
    %c0_i32_1 = arith.constant 0 : i32
    return %c0_i32, %c0_i32_0 : i32, i32
  }
  func.func @transform_5(%arg0: i32) -> (i32, i32) {
    %c0_i32 = arith.constant 0 : i32
    %c0_i32_0 = arith.constant 0 : i32
    %c0_i32_1 = arith.constant 0 : i32
    return %c0_i32, %c0_i32_0 : i32, i32
  }
  func.func @transform_6(%arg0: i32) -> (i32, i32) {
    %c0_i32 = arith.constant 0 : i32
    %c0_i32_0 = arith.constant 0 : i32
    %c0_i32_1 = arith.constant 0 : i32
    return %c0_i32, %c0_i32_0 : i32, i32
  }
  func.func @transform_7(%arg0: i32) -> (i32, i32) {
    %c0_i32 = arith.constant 0 : i32
    %c0_i32_0 = arith.constant 0 : i32
    %c0_i32_1 = arith.constant 0 : i32
    return %c0_i32, %c0_i32_0 : i32, i32
  }
  func.func @transform_8(%arg0: i32) -> (i32, i32) {
    %c0_i32 = arith.constant 0 : i32
    %c0_i32_0 = arith.constant 0 : i32
    %c0_i32_1 = arith.constant 0 : i32
    return %c0_i32, %c0_i32_0 : i32, i32
  }
  func.func @transform_9(%arg0: i32) -> (i32, i32) {
    %c0_i32 = arith.constant 0 : i32
    %c0_i32_0 = arith.constant 0 : i32
    %c0_i32_1 = arith.constant 0 : i32
    return %c0_i32, %c0_i32_0 : i32, i32
  }
  func.func @transform_10(%arg0: i32) -> (i32, i32) {
    %c0_i32 = arith.constant 0 : i32
    %c0_i32_0 = arith.constant 0 : i32
    %c0_i32_1 = arith.constant 0 : i32
    return %c0_i32, %c0_i32_0 : i32, i32
  }
  func.func @transform_11(%arg0: i32) -> (i32, i32) {
    %c0_i32 = arith.constant 0 : i32
    %c0_i32_0 = arith.constant 0 : i32
    return %c0_i32, %arg0 : i32, i32
  }
  func.func @transform_12(%arg0: i32) -> (i32, i32) {
    %c0_i32 = arith.constant 0 : i32
    %c0_i32_0 = arith.constant 0 : i32
    return %c0_i32, %arg0 : i32, i32
  }
}

</mosaic_0001>

<bundles_post_ra>
// kernel: tpu_custom_call.1
= control target key start
LH: loop header
LB: loop body
LE: loop exit
PB: predicated region body
PF: predicated region fallthrough
CT: control target
= control target key end

     0   :  { %s4605_s0 = inlined_call_operand.vmem [shape: f32[4,1024], index: 0, kind: input, shape index: {}]   ;;  %s4606_s1 = inlined_call_operand.vmem [shape: f32[128,4], index: 1, kind: input, shape index: {}]   ;;  %s4607_s2 = inlined_call_operand.vmem [shape: f32[128,1], index: 2, kind: input, shape index: {}]   ;;  %s4608_s3 = inlined_call_operand.vmem [shape: f32[128,128], index: 3, kind: input, shape index: {}]   ;;  %s4609_s4 = inlined_call_operand.vmem [shape: f32[128,1], index: 4, kind: input, shape index: {}]   ;;  %s4610_s5 = inlined_call_operand.vmem [shape: f32[1,128], index: 5, kind: input, shape index: {}]   ;;  %s4611_s6 = inlined_call_operand.<no memory space> [shape: f32[1,1], index: 6, kind: input, shape index: {}]   ;;  %s4612_s7 = inlined_call_operand.vmem [shape: f32[64,4], index: 7, kind: input, shape index: {}]   ;;  %s4613_s8 = inlined_call_operand.vmem [shape: f32[64,1], index: 8, kind: input, shape index: {}]   ;;  %s4614_s9 = inlined_call_operand.vmem [shape: f32[1,64], index: 9, kind: input, shape index: {}]   ;;  %s4615_s11 = inlined_call_operand.hbm [shape: f32[1,1024], index: 11, kind: output, shape index: {0}]   ;;  %s4616_s12 = inlined_call_operand.hbm [shape: f32[1,1024], index: 12, kind: output, shape index: {1}]   ;;  %s4617_s10 = inlined_call_operand.<no memory space> [shape: f32[1,1], index: 10, kind: input, shape index: {}]  }
   0x1   :  { %4694 = sst [smem:[#allocation55_spill]] %s4605_s0  ;;  %v18_v0 = vstv %s4611_s6  ;;  %v20_v1 = vstv %s4617_s10 }
   0x2   :  { %4695 = sst [smem:[#allocation56_spill]] %s4606_s1  ;;  %19 = vst [vmem:[#allocation2] sm:$0x1] %v18_v0  ;;  %21 = vst [vmem:[#allocation3] sm:$0x1] %v20_v1 }
   0x3   :  { %4696 = sst [smem:[#allocation57_spill]] %s4607_s2 }
   0x4   :  { %22 = vsyncpa [#allocation5], 0 }
   0x5   :  { %24 = vsyncpa [#allocation5 + $0x1], 0 }
   0x6   :  { %25 = vsyncpa [#allocation7], 0 }
   0x7   :  { %27 = vsyncpa [#allocation7 + $0x1], 0  ;;  %s3169_s25 = smov 0   ;;  %s3171_s26 = smov 0  }
   0x8   :  { %s3173_s27 = smov 0   ;;  %s3175_s28 = smov 0  }
   0x9 LB: > { %s3190_s6 = sadd.s32 4294967295, %s3091_s28   ;;  %s2744_s10 = sadd.s32 4294967294, %s3091_s28   ;;  %s3091_s28 = sphi %s3175_s28, %s4959_s28   ;;  %s3087_s27 = sphi %s3173_s27, %s4958_s27   ;;  %s3083_s26 = sphi %s3171_s26, %s4957_s26   ;;  %s3079_s25 = sphi %s3169_s25, %s4956_s25  }
   0xa   : > { %s3194_s29 = sadd.s32 1, %s3091_s28   ;;  %s276_s30 = sadd.s32 1, %s3087_s27 }
   0xb   : > { %s273_s13 = ssub.s32 %s3091_s28, %s3194_s29  ;;  %p286_p0 = scmp.ne.s32.totalorder %s3087_s27, %s3083_s26 }
   0xc   : > { %p274_p1 = scmp.eq.s32.totalorder %s273_s13, 0  ;;  %p287_p2 = scmp.eq.s32.totalorder %s3190_s6, 1 }
   0xd   : > { %p292_p3 = scmp.ne.s32.totalorder %s3083_s26, %s3079_s25  ;;  %p293_p4 = scmp.eq.s32.totalorder %s2744_s10, 1 }
   0xe   : > { %s3205_s14 = scalar_select %p274_p1, %s3087_s27, %s276_s30  }
   0xf   : > { %p3207_p5 = por %p287_p2, %p286_p0  ;;  %p3211_p6 = por %p293_p4, %p292_p3 }
  0x10   : > { %p2747_p7 = scmp.ge.s32.totalorder %s3091_s28, 1  ;;  %p376_p8 = scmp.lt.s32.totalorder %s3091_s28, 3 }
  0x12   : > { %p377_p9 = pnand %p2747_p7, %p376_p8 }
  0x14   : > { %380 = sbr.rel (%p377_p9) target bundleno = 1172 (0x494), region = 64 }
  0x19   : > { %s2750_s17 = sshll.u32 %s3190_s6, 2  ;;  %v4618_v2 = vmov 0.0   ;;  %v3094_v3 = vmov 0   ;;  %s4699_s2 = sld [smem:[#allocation57_spill]]  ;;  %vm598_vm0 = vcmask 1043456   ;;  %vm549_vm1 = vcmask 31744  }
  0x1a   : > { %p424_p10 = scmp.lt.s32.totalorder %s2750_s17, 7  ;;  %671 = vmatprep.mubr.f32.mxu0 %v4618_v2  ;;  %832 = vmatprep.mubr.f32.mxu1 %v4618_v2  ;;  %s4700_s0 = sld [smem:[#allocation55_spill]]  ;;  %v1024_v31 = vld [vmem:[%s4609_s4 + $0x78] sm:$0xff]  ;;  %v1023_v32 = vld [vmem:[%s4609_s4 + $0x70] sm:$0xff]  ;;  %v1022_v34 = vld [vmem:[%s4609_s4 + $0x68] sm:$0xff] }
  0x1b   : > { %2868 = vset.pattern.permute.xlu1 %v3094_v3  ;;  %2867 = vset.pattern.permute.xlu0 %v3094_v3  ;;  %s4703_s1 = sld [smem:[#allocation56_spill]]  ;;  %v1021_v35 = vld [vmem:[%s4609_s4 + $0x60] sm:$0xff]  ;;  %v1020_v37 = vld [vmem:[%s4609_s4 + $0x58] sm:$0xff]  ;;  %v1019_v38 = vld [vmem:[%s4609_s4 + $0x50] sm:$0xff]  ;;  %s4476_s21 = sand.u32 1, %s3083_s26  }
  0x1c   : > { %s4961_s17 = smov (!%p424_p10, %s2750_s17), 7  ;;  %v1018_v40 = vld [vmem:[%s4609_s4 + $0x48] sm:$0xff]  ;;  %v1017_v41 = vld [vmem:[%s4609_s4 + $0x40] sm:$0xff]  ;;  %v1016_v43 = vld [vmem:[%s4609_s4 + $0x38] sm:$0xff]  ;;  %s4693_s13 = sshll.u32 %s3190_s6, 6 }
  0x1d   : > { %s2751_s22 = sshll.u32 %s4961_s17, 2  ;;  %v1015_v44 = vld [vmem:[%s4609_s4 + $0x30] sm:$0xff]  ;;  %v1014_v46 = vld [vmem:[%s4609_s4 + $0x28] sm:$0xff]  ;;  %v1013_v47 = vld [vmem:[%s4609_s4 + $0x20] sm:$0xff]  ;;  %s2637_s17 = scalar_lea.hbm %s4615_s11, %s4693_s13 }
  0x1e   : > { %v1012_v49 = vld [vmem:[%s4609_s4 + $0x18] sm:$0xff]  ;;  %v1011_v50 = vld [vmem:[%s4609_s4 + $0x10] sm:$0xff]  ;;  %v1010_v52 = vld [vmem:[%s4609_s4 + $0x8] sm:$0xff]  ;;  %s3096_s30 = smov [#allocation4]  }
  0x1f   : > { %v462_v4 = vld [vmem:[%s4699_s2 + $0x68] sm:$0xff]  ;;  %v464_v5 = vld [vmem:[%s4699_s2 + $0x78] sm:$0xff]  ;;  %v461_v6 = vld [vmem:[%s4699_s2 + $0x60] sm:$0xff] }
  0x20   : > { %532 = vperm.xlu1 %2868, %v462_v4   ;;  %542 = vperm.xlu0 %2867, %v464_v5   ;;  %s3229_s10 = scalar_lea.vmem %s4700_s0, %s2751_s22  ;;  %v463_v7 = vld [vmem:[%s4699_s2 + $0x70] sm:$0xff]  ;;  %v460_v14 = vld [vmem:[%s4699_s2 + $0x58] sm:$0xff]  ;;  %v457_v16 = vld [vmem:[%s4699_s2 + $0x40] sm:$0xff]  ;;  %s4692_s22 = sshll.u32 %s4476_s21, 2 }
  0x21   : > { %v431_v8 = vld [vmem:[%s3229_s10] sm:$0xff]  ;;  %v432_v9 = vld [vmem:[%s3229_s10 + $0x8] sm:$0xff]  ;;  %v459_v13 = vld [vmem:[%s4699_s2 + $0x50] sm:$0xff]  ;;  %s4512_s23 = scalar_lea.vmem [#allocation4], %s4692_s22  ;;  %s3005_s22 = sshll.u32 %s3096_s30, 4  ;;  %s3006_s22 = int_to_ptr.vmem [resolvable:$false] %s3005_s22 }
  0x22   : > { %v3239_v10 = vcombine.high %v431_v8, %v431_v8  ;;  %v3241_v11 = vcombine.high %v432_v9, %v432_v9  ;;  %v433_v12 = vld [vmem:[%s4703_s1] sm:$0xff]  ;;  %v434_v15 = vld [vmem:[%s4703_s1 + $0x8] sm:$0xff]  ;;  %v435_v18 = vld [vmem:[%s4703_s1 + $0x10] sm:$0xff]  ;;  %s2639_s20 = sshll.u32 %s4512_s23, 4  ;;  %s3007_s0 = scalar_lea.vmem %s3006_s22, 128  ;;  %s2640_s20 = int_to_ptr.vmem [resolvable:$true] %s2639_s20 }
  0x23   : > { %v458_v17 = vld [vmem:[%s4699_s2 + $0x48] sm:$0xff]  ;;  %v455_v19 = vld [vmem:[%s4699_s2 + $0x30] sm:$0xff]  ;;  %v456_v20 = vld [vmem:[%s4699_s2 + $0x38] sm:$0xff]  ;;  %s3001_s24 = scalar_lea.vmem %s2640_s20, 64  ;;  %p3008_p0 = scmp.lt.s32.totalorder %s2640_s20, %s3006_s22 }
  0x24   : > { %4701 = vst [vmem:[#allocation10_spill] sm:$0xff] %v3239_v10  ;;  %4702 = vst [vmem:[#allocation11_spill] sm:$0xff] %v3241_v11  ;;  %527 = vperm.xlu1 %2868, %v461_v6   ;;  %537 = vperm.xlu0 %2867, %v463_v7   ;;  %v436_v21 = vld [vmem:[%s4703_s1 + $0x18] sm:$0xff]  ;;  %v453_v22 = vld [vmem:[%s4699_s2 + $0x20] sm:$0xff]  ;;  %p3002_p11 = scmp.ne.s32.totalorder %s2640_s20, %s3001_s24  ;;  %p3009_p1 = scmp.lt.s32.totalorder %s3007_s0, %s3001_s24 }
  0x25   : > { %2752 = vmatprep.subr.msk.mxu0 %vm598_vm0, %v3239_v10  ;;  %2770 = vmatprep.subr.msk.mxu1 %vm598_vm0, %v3241_v11  ;;  %v454_v23 = vld [vmem:[%s4699_s2 + $0x28] sm:$0xff]  ;;  %v437_v24 = vld [vmem:[%s4703_s1 + $0x20] sm:$0xff]  ;;  %v451_v25 = vld [vmem:[%s4699_s2 + $0x10] sm:$0xff] }
  0x26   : > { %2753 = vmatpush1.msk.msra.mxu0 %vm598_vm0, %v431_v8  ;;  %2771 = vmatpush1.msk.msra.mxu1 %vm598_vm0, %v432_v9  ;;  %v452_v26 = vld [vmem:[%s4699_s2 + $0x18] sm:$0xff]  ;;  %v438_v27 = vld [vmem:[%s4703_s1 + $0x28] sm:$0xff]  ;;  %v449_v28 = vld [vmem:[%s4699_s2] sm:$0xff]  ;;  %p3003_p12 = pnand %p3002_p11, %p3207_p5  ;;  %p3010_p2 = por %p3009_p1, %p3008_p0 }
  0x27   : > { %2754 = vmatmul.mubr.msk.f32.vlgmr.msra.gmra.mxu0 %vm549_vm1, %v433_v12  ;;  %2772 = vmatmul.mubr.msk.f32.vlgmr.msra.gmra.mxu1 %vm549_vm1, %v433_v12  ;;  %v450_v29 = vld [vmem:[%s4699_s2 + $0x8] sm:$0xff]  ;;  %v439_v30 = vld [vmem:[%s4703_s1 + $0x30] sm:$0xff]  ;;  %v440_v33 = vld [vmem:[%s4703_s1 + $0x38] sm:$0xff] }
  0x28   : > { %677 = vmatprep.mubr.f32.mxu0 %v4618_v2  ;;  %838 = vmatprep.mubr.f32.mxu1 %v4618_v2  ;;  %v441_v36 = vld [vmem:[%s4703_s1 + $0x40] sm:$0xff]  ;;  %v442_v39 = vld [vmem:[%s4703_s1 + $0x48] sm:$0xff]  ;;  %v443_v42 = vld [vmem:[%s4703_s1 + $0x50] sm:$0xff]  ;;  %p3004_p13 = pneg %p3003_p12 }
  0x29   : > { %517 = vperm.xlu1 %2868, %v459_v13   ;;  %522 = vperm.xlu0 %2867, %v460_v14   ;;  %v444_v45 = vld [vmem:[%s4703_s1 + $0x58] sm:$0xff]  ;;  %v445_v48 = vld [vmem:[%s4703_s1 + $0x60] sm:$0xff]  ;;  %v446_v51 = vld [vmem:[%s4703_s1 + $0x68] sm:$0xff] }
  0x2a   : > { %v1009_v53 = vld [vmem:[%s4609_s4] sm:$0xff]  ;;  %v447_v54 = vld [vmem:[%s4703_s1 + $0x70] sm:$0xff]  ;;  %v1693_v55 = vld [vmem:[%s4613_s8 + $0x38] sm:$0xff]  ;;  %p3011_p3 = pnand %p3010_p2, %p3004_p13 }
  0x2b   : > { %2755 = vmatmul.mubr.msk.f32.gmra.mxu0 %vm549_vm1, %v434_v15  ;;  %2773 = vmatmul.mubr.msk.f32.gmra.mxu1 %vm549_vm1, %v434_v15  ;;  %v1692_v56 = vld [vmem:[%s4613_s8 + $0x30] sm:$0xff]  ;;  %v448_v57 = vld [vmem:[%s4703_s1 + $0x78] sm:$0xff]  ;;  %v1691_v58 = vld [vmem:[%s4613_s8 + $0x28] sm:$0xff] }
  0x2c   : > { %683 = vmatprep.mubr.f32.mxu0 %v4618_v2  ;;  %844 = vmatprep.mubr.f32.mxu1 %v4618_v2  ;;  %v1690_v59 = vld [vmem:[%s4613_s8 + $0x20] sm:$0xff]  ;;  %v1689_v60 = vld [vmem:[%s4613_s8 + $0x18] sm:$0xff]  ;;  %v1688_v61 = vld [vmem:[%s4613_s8 + $0x10] sm:$0xff] }
  0x2d   : > { %507 = vperm.xlu1 %2868, %v457_v16   ;;  %512 = vperm.xlu0 %2867, %v458_v17   ;;  %v1687_v62 = vld [vmem:[%s4613_s8 + $0x8] sm:$0xff]  ;;  %v1686_v63 = vld [vmem:[%s4613_s8] sm:$0xff] }
  0x2e   : > { %v1492_v0 = vld [vmem:[#allocation2] sm:$0x1]  ;;  %v2433_v1 = vld [vmem:[#allocation3] sm:$0x1] }
  0x2f   : > { %2756 = vmatmul.mubr.msk.f32.gmra.mxu0 %vm549_vm1, %v435_v18  ;;  %2774 = vmatmul.mubr.msk.f32.gmra.mxu1 %vm549_vm1, %v435_v18 }
  0x30   : > { %689 = vmatprep.mubr.f32.mxu0 %v4618_v2  ;;  %850 = vmatprep.mubr.f32.mxu1 %v4618_v2 }
  0x31   : > { %497 = vperm.xlu1 %2868, %v455_v19   ;;  %502 = vperm.xlu0 %2867, %v456_v20  }
  0x33   : > { %2757 = vmatmul.mubr.msk.f32.gmra.mxu0 %vm549_vm1, %v436_v21  ;;  %2775 = vmatmul.mubr.msk.f32.gmra.mxu1 %vm549_vm1, %v436_v21 }
  0x34   : > { %695 = vmatprep.mubr.f32.mxu0 %v4618_v2  ;;  %856 = vmatprep.mubr.f32.mxu1 %v4618_v2 }
  0x35   : > { %487 = vperm.xlu1 %2868, %v453_v22   ;;  %492 = vperm.xlu0 %2867, %v454_v23  }
  0x37   : > { %2758 = vmatmul.mubr.msk.f32.gmra.mxu0 %vm549_vm1, %v437_v24  ;;  %2776 = vmatmul.mubr.msk.f32.gmra.mxu1 %vm549_vm1, %v437_v24 }
  0x38   : > { %701 = vmatprep.mubr.f32.mxu0 %v4618_v2  ;;  %862 = vmatprep.mubr.f32.mxu1 %v4618_v2 }
  0x39   : > { %477 = vperm.xlu1 %2868, %v451_v25   ;;  %482 = vperm.xlu0 %2867, %v452_v26  }
  0x3b   : > { %2759 = vmatmul.mubr.msk.f32.gmra.mxu0 %vm549_vm1, %v438_v27  ;;  %2777 = vmatmul.mubr.msk.f32.gmra.mxu1 %vm549_vm1, %v438_v27 }
  0x3c   : > { %707 = vmatprep.mubr.f32.mxu0 %v4618_v2  ;;  %868 = vmatprep.mubr.f32.mxu1 %v4618_v2 }
  0x3d   : > { %467 = vperm.xlu1 %2868, %v449_v28   ;;  %472 = vperm.xlu0 %2867, %v450_v29  }
  0x3f   : > { %2760 = vmatmul.mubr.msk.f32.gmra.mxu0 %vm549_vm1, %v439_v30  ;;  %2778 = vmatmul.mubr.msk.f32.gmra.mxu1 %vm549_vm1, %v439_v30 }
  0x40   : > { %713 = vmatprep.mubr.f32.mxu0 %v4618_v2  ;;  %874 = vmatprep.mubr.f32.mxu1 %v4618_v2 }
  0x41   : > { %1102 = vperm.xlu0 %2867, %v1024_v31   ;;  %1097 = vperm.xlu1 %2868, %v1023_v32  }
  0x43   : > { %2761 = vmatmul.mubr.msk.f32.gmra.mxu0 %vm549_vm1, %v440_v33  ;;  %2779 = vmatmul.mubr.msk.f32.gmra.mxu1 %vm549_vm1, %v440_v33 }
  0x44   : > { %719 = vmatprep.mubr.f32.mxu0 %v4618_v2  ;;  %880 = vmatprep.mubr.f32.mxu1 %v4618_v2 }
  0x45   : > { %1092 = vperm.xlu0 %2867, %v1022_v34   ;;  %1087 = vperm.xlu1 %2868, %v1021_v35  }
  0x47   : > { %2762 = vmatmul.mubr.msk.f32.gmra.mxu0 %vm549_vm1, %v441_v36  ;;  %2780 = vmatmul.mubr.msk.f32.gmra.mxu1 %vm549_vm1, %v441_v36 }
  0x48   : > { %725 = vmatprep.mubr.f32.mxu0 %v4618_v2  ;;  %886 = vmatprep.mubr.f32.mxu1 %v4618_v2 }
  0x49   : > { %1082 = vperm.xlu0 %2867, %v1020_v37   ;;  %1077 = vperm.xlu1 %2868, %v1019_v38  }
  0x4b   : > { %2763 = vmatmul.mubr.msk.f32.gmra.mxu0 %vm549_vm1, %v442_v39  ;;  %2781 = vmatmul.mubr.msk.f32.gmra.mxu1 %vm549_vm1, %v442_v39 }
  0x4c   : > { %731 = vmatprep.mubr.f32.mxu0 %v4618_v2  ;;  %892 = vmatprep.mubr.f32.mxu1 %v4618_v2 }
  0x4d   : > { %1072 = vperm.xlu0 %2867, %v1018_v40   ;;  %1067 = vperm.xlu1 %2868, %v1017_v41  }
  0x4f   : > { %2764 = vmatmul.mubr.msk.f32.gmra.mxu0 %vm549_vm1, %v443_v42  ;;  %2782 = vmatmul.mubr.msk.f32.gmra.mxu1 %vm549_vm1, %v443_v42 }
  0x50   : > { %737 = vmatprep.mubr.f32.mxu0 %v4618_v2  ;;  %898 = vmatprep.mubr.f32.mxu1 %v4618_v2 }
  0x51   : > { %1062 = vperm.xlu0 %2867, %v1016_v43   ;;  %1057 = vperm.xlu1 %2868, %v1015_v44  }
  0x53   : > { %2765 = vmatmul.mubr.msk.f32.gmra.mxu0 %vm549_vm1, %v444_v45  ;;  %2783 = vmatmul.mubr.msk.f32.gmra.mxu1 %vm549_vm1, %v444_v45 }
  0x54   : > { %743 = vmatprep.mubr.f32.mxu0 %v4618_v2  ;;  %904 = vmatprep.mubr.f32.mxu1 %v4618_v2 }
  0x55   : > { %1052 = vperm.xlu0 %2867, %v1014_v46   ;;  %1047 = vperm.xlu1 %2868, %v1013_v47  }
  0x57   : > { %2766 = vmatmul.mubr.msk.f32.gmra.mxu0 %vm549_vm1, %v445_v48  ;;  %2784 = vmatmul.mubr.msk.f32.gmra.mxu1 %vm549_vm1, %v445_v48 }
  0x58   : > { %749 = vmatprep.mubr.f32.mxu0 %v4618_v2  ;;  %910 = vmatprep.mubr.f32.mxu1 %v4618_v2 }
  0x59   : > { %1042 = vperm.xlu0 %2867, %v1012_v49   ;;  %1037 = vperm.xlu1 %2868, %v1011_v50  }
  0x5b   : > { %2767 = vmatmul.mubr.msk.f32.gmra.mxu0 %vm549_vm1, %v446_v51  ;;  %2785 = vmatmul.mubr.msk.f32.gmra.mxu1 %vm549_vm1, %v446_v51 }
  0x5c   : > { %755 = vmatprep.mubr.f32.mxu0 %v4618_v2  ;;  %916 = vmatprep.mubr.f32.mxu1 %v4618_v2 }
  0x5d   : > { %1032 = vperm.xlu0 %2867, %v1010_v52   ;;  %1027 = vperm.xlu1 %2868, %v1009_v53  }
  0x5f   : > { %2768 = vmatmul.mubr.msk.f32.gmra.mxu0 %vm549_vm1, %v447_v54  ;;  %2786 = vmatmul.mubr.msk.f32.gmra.mxu1 %vm549_vm1, %v447_v54 }
  0x60   : > { %761 = vmatprep.mubr.f32.mxu0 %v4618_v2  ;;  %922 = vmatprep.mubr.f32.mxu1 %v4618_v2 }
  0x61   : > { %1731 = vperm.xlu0 %2867, %v1693_v55   ;;  %1726 = vperm.xlu1 %2868, %v1692_v56  }
  0x63   : > { %2769 = vmatmul.mubr.msk.f32.gmra.mxu0 %vm549_vm1, %v448_v57  ;;  %2787 = vmatmul.mubr.msk.f32.gmra.mxu1 %vm549_vm1, %v448_v57 }
  0x64   : > { %1169 = vmatprep.mubr.f32.mxu0 %v4618_v2  ;;  %1330 = vmatprep.mubr.f32.mxu1 %v4618_v2 }
  0x65   : > { %1721 = vperm.xlu0 %2867, %v1691_v58   ;;  %1716 = vperm.xlu1 %2868, %v1690_v59  }
  0x69   : > { %1711 = vperm.xlu0 %2867, %v1689_v60   ;;  %1706 = vperm.xlu1 %2868, %v1688_v61  }
  0x6d   : > { %1701 = vperm.xlu0 %2867, %v1687_v62   ;;  %1696 = vperm.xlu1 %2868, %v1686_v63  }
  0x71   : > { %1495 = vperm.xlu0 %2867, %v1492_v0   ;;  %2436 = vperm.xlu1 %2868, %v2433_v1  }
  0x9b   : > { %v543_v51 = vpop.permute.xlu0 %542  ;;  %v533_v54 = vpop.permute.xlu1 %532 }
  0x9f   : > { %v538_v59 = vpop.permute.xlu0 %537  ;;  %v528_v62 = vpop.permute.xlu1 %527 }
  0xa4   : > { %v523_v11 = vpop.permute.xlu0 %522 }
  0xe7   : > { %v3469_v3 = vpop.f32.mrf.mxu0  ;;  %v3471_v4 = vpop.f32.mrf.mxu1 }
  0xe8   : > { %4704 = vst [vmem:[#allocation12_spill] sm:$0xff] %v3469_v3  ;;  %4705 = vst [vmem:[#allocation13_spill] sm:$0xff] %v3471_v4  ;;  %v518_v3 = vpop.permute.xlu1 %517 }
  0xe9   : > { %v3473_v5 = vpop.f32.mrf.mxu0  ;;  %v3475_v6 = vpop.f32.mrf.mxu1 }
  0xea   : > { %4706 = vst [vmem:[#allocation14_spill] sm:$0xff] %v3473_v5  ;;  %4707 = vst [vmem:[#allocation15_spill] sm:$0xff] %v3475_v6 }
  0xeb   : > { %v3477_v7 = vpop.f32.mrf.mxu0  ;;  %v3479_v8 = vpop.f32.mrf.mxu1 }
  0xec   : > { %4708 = vst [vmem:[#allocation16_spill] sm:$0xff] %v3477_v7  ;;  %4709 = vst [vmem:[#allocation17_spill] sm:$0xff] %v3479_v8 }
  0xed   : > { %v3481_v9 = vpop.f32.mrf.mxu0  ;;  %v3483_v12 = vpop.f32.mrf.mxu1 }
  0xee   : > { %4710 = vst [vmem:[#allocation18_spill] sm:$0xff] %v3481_v9  ;;  %4711 = vst [vmem:[#allocation19_spill] sm:$0xff] %v3483_v12 }
  0xef   : > { %v3485_v13 = vpop.f32.mrf.mxu0  ;;  %v3487_v14 = vpop.f32.mrf.mxu1 }
  0xf0   : > { %4712 = vst [vmem:[#allocation20_spill] sm:$0xff] %v3485_v13  ;;  %4713 = vst [vmem:[#allocation21_spill] sm:$0xff] %v3487_v14  ;;  %v513_v14 = vpop.permute.xlu0 %512 }
  0xf1   : > { %v3489_v15 = vpop.f32.mrf.mxu0  ;;  %v3491_v16 = vpop.f32.mrf.mxu1 }
  0xf2   : > { %4714 = vst [vmem:[#allocation22_spill] sm:$0xff] %v3489_v15  ;;  %4715 = vst [vmem:[#allocation23_spill] sm:$0xff] %v3491_v16 }
  0xf3   : > { %v3493_v17 = vpop.f32.mrf.mxu0  ;;  %v3495_v18 = vpop.f32.mrf.mxu1 }
  0xf4   : > { %4716 = vst [vmem:[#allocation24_spill] sm:$0xff] %v3493_v17  ;;  %4717 = vst [vmem:[#allocation25_spill] sm:$0xff] %v3495_v18 }
  0xf5   : > { %v3497_v19 = vpop.f32.mrf.mxu0  ;;  %v3499_v20 = vpop.f32.mrf.mxu1 }
  0xf6   : > { %4718 = vst [vmem:[#allocation26_spill] sm:$0xff] %v3497_v19  ;;  %4719 = vst [vmem:[#allocation27_spill] sm:$0xff] %v3499_v20  ;;  %v3561_v19 = vpop.permute.xlu1 %507 }
  0xf7   : > { %v3501_v21 = vpop.f32.mrf.mxu0  ;;  %v3503_v22 = vpop.f32.mrf.mxu1 }
  0xf8   : > { %4720 = vst [vmem:[#allocation28_spill] sm:$0xff] %v3501_v21  ;;  %4721 = vst [vmem:[#allocation29_spill] sm:$0xff] %v3503_v22 }
  0xf9   : > { %v3505_v23 = vpop.f32.mrf.mxu0  ;;  %v3507_v24 = vpop.f32.mrf.mxu1 }
  0xfa   : > { %4722 = vst [vmem:[#allocation30_spill] sm:$0xff] %v3505_v23  ;;  %4723 = vst [vmem:[#allocation31_spill] sm:$0xff] %v3507_v24 }
  0xfb   : > { %v3509_v25 = vpop.f32.mrf.mxu0  ;;  %v3511_v26 = vpop.f32.mrf.mxu1 }
  0xfc   : > { %4724 = vst [vmem:[#allocation32_spill] sm:$0xff] %v3509_v25  ;;  %4725 = vst [vmem:[#allocation33_spill] sm:$0xff] %v3511_v26 }
  0xfd   : > { %v3513_v27 = vpop.f32.mrf.mxu0  ;;  %v3515_v28 = vpop.f32.mrf.mxu1 }
  0xfe   : > { %4726 = vst [vmem:[#allocation34_spill] sm:$0xff] %v3513_v27  ;;  %4727 = vst [vmem:[#allocation35_spill] sm:$0xff] %v3515_v28 }
  0xff   : > { %v3517_v29 = vpop.f32.mrf.mxu0  ;;  %v3519_v30 = vpop.f32.mrf.mxu1 }
 0x100   : > { %4728 = vst [vmem:[#allocation36_spill] sm:$0xff] %v3517_v29  ;;  %4729 = vst [vmem:[#allocation37_spill] sm:$0xff] %v3519_v30 }
 0x101   : > { %v3521_v31 = vpop.f32.mrf.mxu0  ;;  %v3523_v32 = vpop.f32.mrf.mxu1 }
 0x103   : > { %v3525_v33 = vpop.f32.mrf.mxu0  ;;  %v3527_v34 = vpop.f32.mrf.mxu1 }
 0x105   : > { %v3529_v35 = vpop.f32.mrf.mxu0  ;;  %v3531_v36 = vpop.f32.mrf.mxu1 }
 0x107   : > { %v3533_v37 = vpop.f32.mrf.mxu0  ;;  %v3535_v38 = vpop.f32.mrf.mxu1 }
 0x109   : > { %v3537_v39 = vpop.f32.mrf.mxu0  ;;  %v3539_v40 = vpop.f32.mrf.mxu1 }
 0x10b   : > { %v3541_v41 = vpop.f32.mrf.mxu0  ;;  %v3543_v42 = vpop.f32.mrf.mxu1 }
 0x10d   : > { %v3545_v43 = vpop.f32.mrf.mxu0  ;;  %v3547_v44 = vpop.f32.mrf.mxu1 }
 0x10f   : > { %v3549_v45 = vpop.f32.mrf.mxu0  ;;  %v3551_v46 = vpop.f32.mrf.mxu1 }
 0x111   : > { %v3553_v47 = vpop.f32.mrf.mxu0  ;;  %v3555_v48 = vpop.f32.mrf.mxu1 }
 0x113   : > { %v3557_v49 = vpop.f32.mrf.mxu0  ;;  %v3559_v50 = vpop.f32.mrf.mxu1 }
 0x115   : > { %v741_v52 = vpop.f32.mrf.mxu0  ;;  %v902_v53 = vpop.f32.mrf.mxu1 }
 0x117   : > { %v745_v55 = vpop.f32.mrf.mxu0  ;;  %v906_v56 = vpop.f32.mrf.mxu1 }
 0x119   : > { %v747_v57 = vpop.f32.mrf.mxu0  ;;  %v908_v58 = vpop.f32.mrf.mxu1 }
 0x11a   : > { %v909_v27 = vadd.f32 %v908_v58, %v528_v62 }
 0x11b   : > { %v751_v60 = vpop.f32.mrf.mxu0  ;;  %v912_v61 = vpop.f32.mrf.mxu1 }
 0x11c   : > { %v752_v26 = vadd.f32 %v751_v60, %v533_v54  ;;  %v913_v25 = vadd.f32 %v912_v61, %v533_v54 }
 0x11d   : > { %v753_v63 = vpop.f32.mrf.mxu0  ;;  %v914_v0 = vpop.f32.mrf.mxu1 }
 0x11e   : > { %v754_v22 = vadd.f32 %v753_v63, %v533_v54  ;;  %v915_v21 = vadd.f32 %v914_v0, %v533_v54 }
 0x11f   : > { %v757_v1 = vpop.f32.mrf.mxu0  ;;  %v918_v2 = vpop.f32.mrf.mxu1 }
 0x120   : > { %v758_v17 = vadd.f32 %v757_v1, %v538_v59  ;;  %v919_v20 = vadd.f32 %v918_v2, %v538_v59  ;;  %v4732_v1 = vld [vmem:[#allocation34_spill] sm:$0xff] }
 0x121   : > { %v759_v10 = vpop.f32.mrf.mxu0  ;;  %v920_v4 = vpop.f32.mrf.mxu1 }
 0x122   : > { %v760_v13 = vadd.f32 %v759_v10, %v538_v59  ;;  %v921_v16 = vadd.f32 %v920_v4, %v538_v59  ;;  %v746_v10 = vadd.f32 %v745_v55, %v528_v62  ;;  %v907_v4 = vadd.f32 %v906_v56, %v528_v62 }
 0x123   : > { %v763_v6 = vpop.f32.mrf.mxu0  ;;  %v924_v5 = vpop.f32.mrf.mxu1  ;;  %v987_v2 = vmax.f32 %v919_v20, 0.0  ;;  %v984_v59 = vmax.f32 %v915_v21, 0.0  ;;  %v897_v20 = vadd.f32 %v3555_v48, %v518_v3  ;;  %v734_v21 = vadd.f32 %v3549_v45, %v518_v3 }
 0x124   : > { %v764_v8 = vadd.f32 %v763_v6, %v543_v51  ;;  %v925_v7 = vadd.f32 %v924_v5, %v543_v51  ;;  %v748_v5 = vadd.f32 %v747_v57, %v528_v62  ;;  %v986_v30 = vmax.f32 %v760_v13, 0.0  ;;  %v4731_v62 = vld [vmem:[#allocation37_spill] sm:$0xff] }
 0x125   : > { %v765_v12 = vpop.f32.mrf.mxu0  ;;  %v926_v9 = vpop.f32.mrf.mxu1  ;;  %v988_v29 = vmax.f32 %v921_v16, 0.0  ;;  %v981_v13 = vmax.f32 %v752_v26, 0.0  ;;  %v983_v16 = vmax.f32 %v913_v25, 0.0  ;;  %v891_v25 = vadd.f32 %v3547_v44, %v513_v14 }
 0x126   : > { %v766_v15 = vadd.f32 %v765_v12, %v543_v51  ;;  %v927_v18 = vadd.f32 %v926_v9, %v543_v51  ;;  %v989_v28 = vmax.f32 %v764_v8, 0.0  ;;  %v991_v6 = vmax.f32 %v925_v7, 0.0  ;;  %v503_v12 = vpop.permute.xlu0 %502 }
 0x127   : > { %v985_v9 = vmax.f32 %v758_v17, 0.0  ;;  %v742_v51 = vadd.f32 %v741_v52, %v523_v11  ;;  %v740_v7 = vadd.f32 %v3557_v49, %v523_v11  ;;  %v901_v8 = vadd.f32 %v3559_v50, %v523_v11 }
 0x128   : > { %v990_v24 = vmax.f32 %v766_v15, 0.0  ;;  %v992_v23 = vmax.f32 %v927_v18, 0.0  ;;  %v903_v15 = vadd.f32 %v902_v53, %v523_v11  ;;  %v982_v18 = vmax.f32 %v754_v22, 0.0 }
 0x129   : > { %v736_v17 = vadd.f32 %v3553_v47, %v518_v3  ;;  %v895_v22 = vadd.f32 %v3551_v46, %v518_v3  ;;  %v730_v11 = vadd.f32 %v3545_v43, %v513_v14  ;;  %v974_v26 = vmax.f32 %v742_v51, 0.0 }
 0x12a   : > { %1105 = vmatprep.subr.mxu0 %v990_v24  ;;  %1266 = vmatprep.subr.mxu1 %v992_v23  ;;  %v498_v23 = vpop.permute.xlu1 %497  ;;  %v978_v24 = vmax.f32 %v748_v5, 0.0  ;;  %v976_v47 = vmax.f32 %v903_v15, 0.0  ;;  %v889_v48 = vadd.f32 %v3543_v42, %v513_v14  ;;  %v973_v49 = vmax.f32 %v740_v7, 0.0  ;;  %v493_v3 = vpop.permute.xlu0 %492  ;;  %v4733_v5 = vld [vmem:[#allocation35_spill] sm:$0xff] }
 0x12b   : > { %1106 = vmatpush1.msra.mxu0 %v989_v28  ;;  %1267 = vmatpush1.msra.mxu1 %v991_v6  ;;  %v980_v28 = vmax.f32 %v909_v27, 0.0  ;;  %v728_v27 = vadd.f32 %v3541_v41, %v513_v14  ;;  %v975_v45 = vmax.f32 %v901_v8, 0.0  ;;  %v724_v46 = vadd.f32 %v3537_v39, %v3561_v19  ;;  %v4737_v8 = vld [vmem:[#allocation31_spill] sm:$0xff] }
 0x12c   : > { %1107 = vmatprep.subr.mxu0 %v986_v30  ;;  %1268 = vmatprep.subr.mxu1 %v988_v29  ;;  %v977_v29 = vmax.f32 %v746_v10, 0.0  ;;  %v979_v30 = vmax.f32 %v907_v4, 0.0  ;;  %v885_v43 = vadd.f32 %v3539_v40, %v3561_v19  ;;  %v970_v44 = vmax.f32 %v736_v17, 0.0  ;;  %v4738_v17 = vld [vmem:[#allocation28_spill] sm:$0xff] }
 0x12d   : > { %1108 = vmatpush1.msra.mxu0 %v985_v9  ;;  %1269 = vmatpush1.msra.mxu1 %v987_v2  ;;  %v972_v50 = vmax.f32 %v897_v20, 0.0  ;;  %v722_v41 = vadd.f32 %v3533_v37, %v3561_v19  ;;  %v883_v14 = vadd.f32 %v3535_v38, %v3561_v19  ;;  %v969_v42 = vmax.f32 %v734_v21, 0.0  ;;  %v4735_v2 = vld [vmem:[#allocation33_spill] sm:$0xff] }
 0x12e   : > { %1109 = vmatprep.subr.mxu0 %v982_v18  ;;  %1270 = vmatprep.subr.mxu1 %v984_v59  ;;  %v971_v52 = vmax.f32 %v895_v22, 0.0  ;;  %v488_v53 = vpop.permute.xlu1 %487  ;;  %v718_v39 = vadd.f32 %v3529_v35, %v503_v12  ;;  %v879_v54 = vadd.f32 %v3531_v36, %v503_v12  ;;  %v966_v40 = vmax.f32 %v730_v11, 0.0  ;;  %v4730_v36 = vld [vmem:[#allocation36_spill] sm:$0xff]  ;;  %v4736_v59 = vld [vmem:[#allocation30_spill] sm:$0xff]  ;;  %v4741_v11 = vld [vmem:[#allocation27_spill] sm:$0xff] }
 0x12f   : > { %1110 = vmatpush1.msra.mxu0 %v981_v13  ;;  %1271 = vmatpush1.msra.mxu1 %v983_v16  ;;  %v968_v55 = vmax.f32 %v891_v25, 0.0  ;;  %v716_v56 = vadd.f32 %v3525_v33, %v503_v12  ;;  %v877_v37 = vadd.f32 %v3527_v34, %v503_v12  ;;  %v965_v57 = vmax.f32 %v728_v27, 0.0  ;;  %v483_v34 = vpop.permute.xlu0 %482  ;;  %v4742_v27 = vld [vmem:[#allocation24_spill] sm:$0xff] }
 0x130   : > { %1111 = vmatprep.subr.mxu0 %v978_v24  ;;  %1272 = vmatprep.subr.mxu1 %v980_v28  ;;  %v967_v58 = vmax.f32 %v889_v48, 0.0  ;;  %v712_v19 = vadd.f32 %v3521_v31, %v498_v23  ;;  %v873_v38 = vadd.f32 %v3523_v32, %v498_v23  ;;  %v962_v60 = vmax.f32 %v724_v46, 0.0  ;;  %v4734_v32 = vld [vmem:[#allocation32_spill] sm:$0xff]  ;;  %v4739_v24 = vld [vmem:[#allocation29_spill] sm:$0xff] }
 0x131   : > { %1112 = vmatpush1.msra.mxu0 %v977_v29  ;;  %1273 = vmatpush1.msra.mxu1 %v979_v30  ;;  %v964_v35 = vmax.f32 %v885_v43, 0.0  ;;  %v710_v61 = vadd.f32 %v4730_v36, %v498_v23  ;;  %v871_v63 = vadd.f32 %v4731_v62, %v498_v23  ;;  %v961_v0 = vmax.f32 %v722_v41, 0.0  ;;  %v4740_v29 = vld [vmem:[#allocation26_spill] sm:$0xff]  ;;  %v4745_v41 = vld [vmem:[#allocation23_spill] sm:$0xff]  ;;  %v4750_v36 = vld [vmem:[#allocation16_spill] sm:$0xff] }
 0x132   : > { %1113 = vmatprep.subr.mxu0 %v974_v26  ;;  %1274 = vmatprep.subr.mxu1 %v976_v47  ;;  %v963_v33 = vmax.f32 %v883_v14, 0.0  ;;  %v706_v6 = vadd.f32 %v4732_v1, %v493_v3  ;;  %v867_v10 = vadd.f32 %v4733_v5, %v493_v3  ;;  %v958_v31 = vmax.f32 %v718_v39, 0.0  ;;  %v478_v18 = vpop.permute.xlu1 %477  ;;  %v4751_v62 = vld [vmem:[#allocation17_spill] sm:$0xff] }
 0x133   : > { %1114 = vmatpush1.msra.mxu0 %v973_v49  ;;  %1275 = vmatpush1.msra.mxu1 %v975_v45  ;;  %v960_v4 = vmax.f32 %v879_v54, 0.0  ;;  %v704_v9 = vadd.f32 %v4734_v32, %v493_v3  ;;  %v865_v12 = vadd.f32 %v4735_v2, %v493_v3  ;;  %v957_v51 = vmax.f32 %v716_v56, 0.0  ;;  %v4743_v49 = vld [vmem:[#allocation25_spill] sm:$0xff]  ;;  %v473_v43 = vpop.permute.xlu0 %472 }
 0x134   : > { %1115 = vmatprep.subr.mxu0 %v970_v44  ;;  %1276 = vmatprep.subr.mxu1 %v972_v50  ;;  %v959_v15 = vmax.f32 %v877_v37, 0.0  ;;  %v700_v7 = vadd.f32 %v4736_v59, %v488_v53  ;;  %v861_v13 = vadd.f32 %v4737_v8, %v488_v53  ;;  %v954_v16 = vmax.f32 %v712_v19, 0.0  ;;  %v4744_v44 = vld [vmem:[#allocation22_spill] sm:$0xff]  ;;  %v4747_v54 = vld [vmem:[#allocation21_spill] sm:$0xff]  ;;  %v4749_v19 = vld [vmem:[#allocation19_spill] sm:$0xff] }
 0x135   : > { %1116 = vmatpush1.msra.mxu0 %v969_v42  ;;  %1277 = vmatpush1.msra.mxu1 %v971_v52  ;;  %v956_v23 = vmax.f32 %v873_v38, 0.0  ;;  %v698_v20 = vadd.f32 %v4738_v17, %v488_v53  ;;  %v859_v28 = vadd.f32 %v4739_v24, %v488_v53  ;;  %v953_v21 = vmax.f32 %v710_v61, 0.0  ;;  %v4746_v53 = vld [vmem:[#allocation20_spill] sm:$0xff] }
 0x136   : > { %1117 = vmatprep.subr.mxu0 %v966_v40  ;;  %1278 = vmatprep.subr.mxu1 %v968_v55  ;;  %v955_v22 = vmax.f32 %v871_v63, 0.0  ;;  %v694_v30 = vadd.f32 %v4740_v29, %v483_v34  ;;  %v855_v25 = vadd.f32 %v4741_v11, %v483_v34  ;;  %v950_v26 = vmax.f32 %v706_v6, 0.0  ;;  %v468_v37 = vpop.permute.xlu1 %467  ;;  %v4753_v6 = vld [vmem:[#allocation15_spill] sm:$0xff]  ;;  %v994_v24 = vld [vmem:[%s4608_s3 + $0x8] sm:$0xff] }
 0x137   : > { %1118 = vmatpush1.msra.mxu0 %v965_v57  ;;  %1279 = vmatpush1.msra.mxu1 %v967_v58  ;;  %v952_v47 = vmax.f32 %v867_v10, 0.0  ;;  %v692_v48 = vadd.f32 %v4742_v27, %v483_v34  ;;  %v853_v45 = vadd.f32 %v4743_v49, %v483_v34  ;;  %v949_v3 = vmax.f32 %v704_v9, 0.0  ;;  %v4748_v57 = vld [vmem:[#allocation18_spill] sm:$0xff]  ;;  %v4755_v9 = vld [vmem:[#allocation13_spill] sm:$0xff]  ;;  %v993_v17 = vld [vmem:[%s4608_s3] sm:$0xff] }
 0x138   : > { %1119 = vmatprep.subr.mxu0 %v962_v60  ;;  %1280 = vmatprep.subr.mxu1 %v964_v35  ;;  %v951_v46 = vmax.f32 %v865_v12, 0.0  ;;  %v688_v50 = vadd.f32 %v4744_v44, %v478_v18  ;;  %v849_v14 = vadd.f32 %v4745_v41, %v478_v18  ;;  %v946_v42 = vmax.f32 %v700_v7, 0.0  ;;  %v4752_v34 = vld [vmem:[#allocation14_spill] sm:$0xff]  ;;  %v998_v29 = vld [vmem:[%s4608_s3 + $0x28] sm:$0xff] }
 0x139   : > { %1120 = vmatpush1.msra.mxu0 %v961_v0  ;;  %1281 = vmatpush1.msra.mxu1 %v963_v33  ;;  %v948_v52 = vmax.f32 %v861_v13, 0.0  ;;  %v686_v39 = vadd.f32 %v4746_v53, %v478_v18  ;;  %v847_v40 = vadd.f32 %v4747_v54, %v478_v18  ;;  %v945_v55 = vmax.f32 %v698_v20, 0.0  ;;  %v1000_v11 = vld [vmem:[%s4608_s3 + $0x38] sm:$0xff]  ;;  %v1006_v49 = vld [vmem:[%s4608_s3 + $0x68] sm:$0xff] }
 0x13a   : > { %1121 = vmatprep.subr.mxu0 %v958_v31  ;;  %1282 = vmatprep.subr.mxu1 %v960_v4  ;;  %v947_v56 = vmax.f32 %v859_v28, 0.0  ;;  %v682_v58 = vadd.f32 %v4748_v57, %v473_v43  ;;  %v843_v38 = vadd.f32 %v4749_v19, %v473_v43  ;;  %v942_v60 = vmax.f32 %v694_v30, 0.0  ;;  %v4754_v4 = vld [vmem:[#allocation12_spill] sm:$0xff]  ;;  %v995_v28 = vld [vmem:[%s4608_s3 + $0x10] sm:$0xff]  ;;  %v1004_v27 = vld [vmem:[%s4608_s3 + $0x58] sm:$0xff] }
 0x13b   : > { %1122 = vmatpush1.msra.mxu0 %v957_v51  ;;  %1283 = vmatpush1.msra.mxu1 %v959_v15  ;;  %v944_v35 = vmax.f32 %v855_v25, 0.0  ;;  %v680_v61 = vadd.f32 %v4750_v36, %v473_v43  ;;  %v841_v63 = vadd.f32 %v4751_v62, %v473_v43  ;;  %v941_v0 = vmax.f32 %v692_v48, 0.0  ;;  %v999_v30 = vld [vmem:[%s4608_s3 + $0x30] sm:$0xff]  ;;  %v1001_v25 = vld [vmem:[%s4608_s3 + $0x40] sm:$0xff] }
 0x13c   : > { %1123 = vmatprep.subr.mxu0 %v954_v16  ;;  %1284 = vmatprep.subr.mxu1 %v956_v23  ;;  %v943_v33 = vmax.f32 %v853_v45, 0.0  ;;  %v676_v1 = vadd.f32 %v4752_v34, %v468_v37  ;;  %v837_v5 = vadd.f32 %v4753_v6, %v468_v37  ;;  %v938_v10 = vmax.f32 %v688_v50, 0.0  ;;  %v1005_v48 = vld [vmem:[%s4608_s3 + $0x60] sm:$0xff]  ;;  %v1007_v45 = vld [vmem:[%s4608_s3 + $0x70] sm:$0xff] }
 0x13d   : > { %1124 = vmatpush1.msra.mxu0 %v953_v21  ;;  %1285 = vmatpush1.msra.mxu1 %v955_v22  ;;  %v940_v31 = vmax.f32 %v849_v14, 0.0  ;;  %v674_v32 = vadd.f32 %v4754_v4, %v468_v37  ;;  %v835_v2 = vadd.f32 %v4755_v9, %v468_v37  ;;  %v937_v12 = vmax.f32 %v686_v39, 0.0  ;;  %v996_v21 = vld [vmem:[%s4608_s3 + $0x18] sm:$0xff]  ;;  %v997_v22 = vld [vmem:[%s4608_s3 + $0x20] sm:$0xff] }
 0x13e   : > { %1125 = vmatprep.subr.mxu0 %v950_v26  ;;  %1286 = vmatprep.subr.mxu1 %v952_v47  ;;  %v939_v51 = vmax.f32 %v847_v40, 0.0  ;;  %v934_v15 = vmax.f32 %v682_v58, 0.0  ;;  %v936_v18 = vmax.f32 %v843_v38, 0.0  ;;  %v933_v59 = vmax.f32 %v680_v61, 0.0  ;;  %v1002_v26 = vld [vmem:[%s4608_s3 + $0x48] sm:$0xff]  ;;  %v1003_v47 = vld [vmem:[%s4608_s3 + $0x50] sm:$0xff] }
 0x13f   : > { %1126 = vmatpush1.msra.mxu0 %v949_v3  ;;  %1287 = vmatpush1.msra.mxu1 %v951_v46  ;;  %v935_v7 = vmax.f32 %v841_v63, 0.0  ;;  %v930_v8 = vmax.f32 %v676_v1, 0.0  ;;  %v932_v13 = vmax.f32 %v837_v5, 0.0  ;;  %v929_v16 = vmax.f32 %v674_v32, 0.0  ;;  %v1008_v3 = vld [vmem:[%s4608_s3 + $0x78] sm:$0xff] }
 0x140   : > { %1127 = vmatprep.subr.mxu0 %v946_v42  ;;  %1288 = vmatprep.subr.mxu1 %v948_v52  ;;  %v931_v23 = vmax.f32 %v835_v2, 0.0  ;;  %v4756_v20 = vmov 0.0  }
 0x141   : > { %1128 = vmatpush1.msra.mxu0 %v945_v55  ;;  %1289 = vmatpush1.msra.mxu1 %v947_v56 }
 0x142   : > { %1129 = vmatprep.subr.mxu0 %v942_v60  ;;  %1290 = vmatprep.subr.mxu1 %v944_v35 }
 0x143   : > { %1130 = vmatpush1.msra.mxu0 %v941_v0  ;;  %1291 = vmatpush1.msra.mxu1 %v943_v33 }
 0x144   : > { %1131 = vmatprep.subr.mxu0 %v938_v10  ;;  %1292 = vmatprep.subr.mxu1 %v940_v31 }
 0x145   : > { %1132 = vmatpush1.msra.mxu0 %v937_v12  ;;  %1293 = vmatpush1.msra.mxu1 %v939_v51 }
 0x146   : > { %1133 = vmatprep.subr.mxu0 %v934_v15  ;;  %1294 = vmatprep.subr.mxu1 %v936_v18 }
 0x147   : > { %1134 = vmatpush1.msra.mxu0 %v933_v59  ;;  %1295 = vmatpush1.msra.mxu1 %v935_v7 }
 0x148   : > { %1135 = vmatprep.subr.mxu0 %v930_v8  ;;  %1296 = vmatprep.subr.mxu1 %v932_v13 }
 0x149   : > { %1136 = vmatpush1.msra.mxu0 %v929_v16  ;;  %1297 = vmatpush1.msra.mxu1 %v931_v23  ;;  %v1103_v23 = vpop.permute.xlu0 %1102 }
 0x14a   : > { %1170 = vmatmul.mubr.f32.vlgmr.msra.gmra.mxu0 %v993_v17  ;;  %1331 = vmatmul.mubr.f32.vlgmr.msra.gmra.mxu1 %v993_v17 }
 0x14b   : > { %1175 = vmatprep.mubr.f32.mxu0 %v4756_v20  ;;  %1336 = vmatprep.mubr.f32.mxu1 %v4756_v20 }
 0x14e   : > { %1176 = vmatmul.mubr.f32.gmra.mxu0 %v994_v24  ;;  %1337 = vmatmul.mubr.f32.gmra.mxu1 %v994_v24 }
 0x14f   : > { %1181 = vmatprep.mubr.f32.mxu0 %v4756_v20  ;;  %1342 = vmatprep.mubr.f32.mxu1 %v4756_v20 }
 0x152   : > { %1182 = vmatmul.mubr.f32.gmra.mxu0 %v995_v28  ;;  %1343 = vmatmul.mubr.f32.gmra.mxu1 %v995_v28  ;;  %v1098_v28 = vpop.permute.xlu1 %1097 }
 0x153   : > { %1187 = vmatprep.mubr.f32.mxu0 %v4756_v20  ;;  %1348 = vmatprep.mubr.f32.mxu1 %v4756_v20 }
 0x156   : > { %1188 = vmatmul.mubr.f32.gmra.mxu0 %v996_v21  ;;  %1349 = vmatmul.mubr.f32.gmra.mxu1 %v996_v21 }
 0x157   : > { %1193 = vmatprep.mubr.f32.mxu0 %v4756_v20  ;;  %1354 = vmatprep.mubr.f32.mxu1 %v4756_v20 }
 0x15a   : > { %1194 = vmatmul.mubr.f32.gmra.mxu0 %v997_v22  ;;  %1355 = vmatmul.mubr.f32.gmra.mxu1 %v997_v22 }
 0x15b   : > { %1199 = vmatprep.mubr.f32.mxu0 %v4756_v20  ;;  %1360 = vmatprep.mubr.f32.mxu1 %v4756_v20 }
 0x15e   : > { %1200 = vmatmul.mubr.f32.gmra.mxu0 %v998_v29  ;;  %1361 = vmatmul.mubr.f32.gmra.mxu1 %v998_v29 }
 0x15f   : > { %1205 = vmatprep.mubr.f32.mxu0 %v4756_v20  ;;  %1366 = vmatprep.mubr.f32.mxu1 %v4756_v20 }
 0x162   : > { %1206 = vmatmul.mubr.f32.gmra.mxu0 %v999_v30  ;;  %1367 = vmatmul.mubr.f32.gmra.mxu1 %v999_v30 }
 0x163   : > { %1211 = vmatprep.mubr.f32.mxu0 %v4756_v20  ;;  %1372 = vmatprep.mubr.f32.mxu1 %v4756_v20 }
 0x166   : > { %1212 = vmatmul.mubr.f32.gmra.mxu0 %v1000_v11  ;;  %1373 = vmatmul.mubr.f32.gmra.mxu1 %v1000_v11  ;;  %v1093_v11 = vpop.permute.xlu0 %1092 }
 0x167   : > { %1217 = vmatprep.mubr.f32.mxu0 %v4756_v20  ;;  %1378 = vmatprep.mubr.f32.mxu1 %v4756_v20 }
 0x16a   : > { %1218 = vmatmul.mubr.f32.gmra.mxu0 %v1001_v25  ;;  %1379 = vmatmul.mubr.f32.gmra.mxu1 %v1001_v25 }
 0x16b   : > { %1223 = vmatprep.mubr.f32.mxu0 %v4756_v20  ;;  %1384 = vmatprep.mubr.f32.mxu1 %v4756_v20 }
 0x16e   : > { %1224 = vmatmul.mubr.f32.gmra.mxu0 %v1002_v26  ;;  %1385 = vmatmul.mubr.f32.gmra.mxu1 %v1002_v26 }
 0x16f   : > { %1229 = vmatprep.mubr.f32.mxu0 %v4756_v20  ;;  %1390 = vmatprep.mubr.f32.mxu1 %v4756_v20 }
 0x172   : > { %1230 = vmatmul.mubr.f32.gmra.mxu0 %v1003_v47  ;;  %1391 = vmatmul.mubr.f32.gmra.mxu1 %v1003_v47  ;;  %v1088_v47 = vpop.permute.xlu1 %1087 }
 0x173   : > { %1235 = vmatprep.mubr.f32.mxu0 %v4756_v20  ;;  %1396 = vmatprep.mubr.f32.mxu1 %v4756_v20 }
 0x176   : > { %1236 = vmatmul.mubr.f32.gmra.mxu0 %v1004_v27  ;;  %1397 = vmatmul.mubr.f32.gmra.mxu1 %v1004_v27 }
 0x177   : > { %1241 = vmatprep.mubr.f32.mxu0 %v4756_v20  ;;  %1402 = vmatprep.mubr.f32.mxu1 %v4756_v20 }
 0x17a   : > { %1242 = vmatmul.mubr.f32.gmra.mxu0 %v1005_v48  ;;  %1403 = vmatmul.mubr.f32.gmra.mxu1 %v1005_v48 }
 0x17b   : > { %1247 = vmatprep.mubr.f32.mxu0 %v4756_v20  ;;  %1408 = vmatprep.mubr.f32.mxu1 %v4756_v20 }
 0x17e   : > { %1248 = vmatmul.mubr.f32.gmra.mxu0 %v1006_v49  ;;  %1409 = vmatmul.mubr.f32.gmra.mxu1 %v1006_v49 }
 0x17f   : > { %1253 = vmatprep.mubr.f32.mxu0 %v4756_v20  ;;  %1414 = vmatprep.mubr.f32.mxu1 %v4756_v20 }
 0x182   : > { %1254 = vmatmul.mubr.f32.gmra.mxu0 %v1007_v45  ;;  %1415 = vmatmul.mubr.f32.gmra.mxu1 %v1007_v45 }
 0x183   : > { %1259 = vmatprep.mubr.f32.mxu0 %v4756_v20  ;;  %1420 = vmatprep.mubr.f32.mxu1 %v4756_v20 }
 0x186   : > { %1260 = vmatmul.mubr.f32.gmra.mxu0 %v1008_v3  ;;  %1421 = vmatmul.mubr.f32.gmra.mxu1 %v1008_v3  ;;  %v1083_v3 = vpop.permute.xlu0 %1082 }
 0x187   : > { %1566 = vmatprep.mubr.f32.mxu0 %v4756_v20  ;;  %1637 = vmatprep.mubr.f32.mxu1 %v4756_v20 }
 0x20a   : > { %v3693_v46 = vpop.f32.mrf.mxu0  ;;  %v3695_v43 = vpop.f32.mrf.mxu1 }
 0x20b   : > { %4757 = vst [vmem:[#allocation36_spill] sm:$0xff] %v3693_v46  ;;  %4758 = vst [vmem:[#allocation37_spill] sm:$0xff] %v3695_v43  ;;  %v1078_v46 = vpop.permute.xlu1 %1077 }
 0x20c   : > { %v3697_v44 = vpop.f32.mrf.mxu0  ;;  %v3699_v50 = vpop.f32.mrf.mxu1 }
 0x20d   : > { %4759 = vst [vmem:[#allocation34_spill] sm:$0xff] %v3697_v44  ;;  %4760 = vst [vmem:[#allocation35_spill] sm:$0xff] %v3699_v50 }
 0x20e   : > { %v3701_v41 = vpop.f32.mrf.mxu0  ;;  %v3703_v14 = vpop.f32.mrf.mxu1 }
 0x20f   : > { %4761 = vst [vmem:[#allocation32_spill] sm:$0xff] %v3701_v41  ;;  %4762 = vst [vmem:[#allocation33_spill] sm:$0xff] %v3703_v14 }
 0x210   : > { %v3705_v42 = vpop.f32.mrf.mxu0  ;;  %v3707_v52 = vpop.f32.mrf.mxu1 }
 0x211   : > { %4763 = vst [vmem:[#allocation30_spill] sm:$0xff] %v3705_v42  ;;  %4764 = vst [vmem:[#allocation31_spill] sm:$0xff] %v3707_v52 }
 0x212   : > { %v3709_v53 = vpop.f32.mrf.mxu0  ;;  %v3711_v39 = vpop.f32.mrf.mxu1 }
 0x213   : > { %4765 = vst [vmem:[#allocation28_spill] sm:$0xff] %v3709_v53  ;;  %4766 = vst [vmem:[#allocation29_spill] sm:$0xff] %v3711_v39 }
 0x214   : > { %v3713_v54 = vpop.f32.mrf.mxu0  ;;  %v3715_v40 = vpop.f32.mrf.mxu1 }
 0x215   : > { %4767 = vst [vmem:[#allocation26_spill] sm:$0xff] %v3713_v54  ;;  %4768 = vst [vmem:[#allocation27_spill] sm:$0xff] %v3715_v40 }
 0x216   : > { %v3717_v55 = vpop.f32.mrf.mxu0  ;;  %v3719_v56 = vpop.f32.mrf.mxu1 }
 0x217   : > { %4769 = vst [vmem:[#allocation24_spill] sm:$0xff] %v3717_v55  ;;  %4770 = vst [vmem:[#allocation25_spill] sm:$0xff] %v3719_v56  ;;  %v1073_v56 = vpop.permute.xlu0 %1072 }
 0x218   : > { %v3721_v37 = vpop.f32.mrf.mxu0  ;;  %v3723_v57 = vpop.f32.mrf.mxu1 }
 0x219   : > { %4771 = vst [vmem:[#allocation22_spill] sm:$0xff] %v3721_v37  ;;  %4772 = vst [vmem:[#allocation23_spill] sm:$0xff] %v3723_v57 }
 0x21a   : > { %v3725_v58 = vpop.f32.mrf.mxu0  ;;  %v3727_v19 = vpop.f32.mrf.mxu1 }
 0x21b   : > { %4773 = vst [vmem:[#allocation20_spill] sm:$0xff] %v3725_v58  ;;  %4774 = vst [vmem:[#allocation21_spill] sm:$0xff] %v3727_v19 }
 0x21c   : > { %v3729_v38 = vpop.f32.mrf.mxu0  ;;  %v3731_v60 = vpop.f32.mrf.mxu1 }
 0x21d   : > { %4775 = vst [vmem:[#allocation18_spill] sm:$0xff] %v3729_v38  ;;  %4776 = vst [vmem:[#allocation19_spill] sm:$0xff] %v3731_v60  ;;  %v3785_v38 = vpop.permute.xlu1 %1067 }
 0x21e   : > { %v3733_v35 = vpop.f32.mrf.mxu0  ;;  %v3735_v36 = vpop.f32.mrf.mxu1 }
 0x21f   : > { %4777 = vst [vmem:[#allocation16_spill] sm:$0xff] %v3733_v35  ;;  %4778 = vst [vmem:[#allocation17_spill] sm:$0xff] %v3735_v36 }
 0x220   : > { %v3737_v61 = vpop.f32.mrf.mxu0  ;;  %v3739_v62 = vpop.f32.mrf.mxu1 }
 0x221   : > { %4779 = vst [vmem:[#allocation14_spill] sm:$0xff] %v3737_v61  ;;  %4780 = vst [vmem:[#allocation15_spill] sm:$0xff] %v3739_v62 }
 0x222   : > { %v3741_v63 = vpop.f32.mrf.mxu0  ;;  %v3743_v0 = vpop.f32.mrf.mxu1 }
 0x223   : > { %4781 = vst [vmem:[#allocation12_spill] sm:$0xff] %v3743_v0 }
 0x224   : > { %v3745_v33 = vpop.f32.mrf.mxu0  ;;  %v3747_v34 = vpop.f32.mrf.mxu1 }
 0x226   : > { %v3749_v1 = vpop.f32.mrf.mxu0  ;;  %v3751_v6 = vpop.f32.mrf.mxu1 }
 0x228   : > { %v3753_v5 = vpop.f32.mrf.mxu0  ;;  %v3755_v10 = vpop.f32.mrf.mxu1 }
 0x22a   : > { %v3757_v31 = vpop.f32.mrf.mxu0  ;;  %v3759_v4 = vpop.f32.mrf.mxu1 }
 0x22c   : > { %v3761_v32 = vpop.f32.mrf.mxu0  ;;  %v3763_v9 = vpop.f32.mrf.mxu1 }
 0x22e   : > { %v3765_v2 = vpop.f32.mrf.mxu0  ;;  %v3767_v12 = vpop.f32.mrf.mxu1 }
 0x230   : > { %v3769_v51 = vpop.f32.mrf.mxu0  ;;  %v3771_v15 = vpop.f32.mrf.mxu1 }
 0x232   : > { %v3773_v18 = vpop.f32.mrf.mxu0  ;;  %v3775_v59 = vpop.f32.mrf.mxu1 }
 0x234   : > { %v3777_v7 = vpop.f32.mrf.mxu0  ;;  %v3779_v8 = vpop.f32.mrf.mxu1 }
 0x236   : > { %v3781_v13 = vpop.f32.mrf.mxu0  ;;  %v3783_v16 = vpop.f32.mrf.mxu1 }
 0x238   : > { %v1239_v17 = vpop.f32.mrf.mxu0  ;;  %v1400_v24 = vpop.f32.mrf.mxu1 }
 0x23a   : > { %v1243_v21 = vpop.f32.mrf.mxu0  ;;  %v1404_v22 = vpop.f32.mrf.mxu1 }
 0x23c   : > { %v1245_v29 = vpop.f32.mrf.mxu0  ;;  %v1406_v30 = vpop.f32.mrf.mxu1 }
 0x23d   : > { %v1407_v61 = vadd.f32 %v1406_v30, %v1088_v47 }
 0x23e   : > { %v1249_v25 = vpop.f32.mrf.mxu0  ;;  %v1410_v26 = vpop.f32.mrf.mxu1 }
 0x23f   : > { %v1250_v36 = vadd.f32 %v1249_v25, %v1093_v11  ;;  %v1411_v35 = vadd.f32 %v1410_v26, %v1093_v11 }
 0x240   : > { %v1251_v27 = vpop.f32.mrf.mxu0  ;;  %v1412_v48 = vpop.f32.mrf.mxu1 }
 0x241   : > { %v1252_v37 = vadd.f32 %v1251_v27, %v1093_v11  ;;  %v1413_v19 = vadd.f32 %v1412_v48, %v1093_v11 }
 0x242   : > { %v1255_v49 = vpop.f32.mrf.mxu0  ;;  %v1416_v45 = vpop.f32.mrf.mxu1 }
 0x243   : > { %v1256_v55 = vadd.f32 %v1255_v49, %v1098_v28  ;;  %v1417_v57 = vadd.f32 %v1416_v45, %v1098_v28  ;;  %v1482_v27 = vmax.f32 %v1413_v19, 0.0  ;;  %v1232_v19 = vadd.f32 %v3773_v18, %v1078_v46  ;;  %v4782_v49 = vld [vmem:[#allocation12_spill] sm:$0xff] }
 0x244   : > { %v1257_v20 = vpop.f32.mrf.mxu0  ;;  %v1418_v43 = vpop.f32.mrf.mxu1 }
 0x245   : > { %v1258_v39 = vadd.f32 %v1257_v20, %v1098_v28  ;;  %v1419_v53 = vadd.f32 %v1418_v43, %v1098_v28  ;;  %v1244_v43 = vadd.f32 %v1243_v21, %v1088_v47  ;;  %v1480_v28 = vmax.f32 %v1252_v37, 0.0  ;;  %v1058_v37 = vpop.permute.xlu1 %1057 }
 0x246   : > { %v1261_v50 = vpop.f32.mrf.mxu0  ;;  %v1422_v44 = vpop.f32.mrf.mxu1  ;;  %v1369_v45 = vadd.f32 %v4782_v49, %v1058_v37  ;;  %v4802_v49 = vld [vmem:[#allocation33_spill] sm:$0xff] }
 0x247   : > { %v1262_v14 = vadd.f32 %v1261_v50, %v1103_v23  ;;  %v1423_v41 = vadd.f32 %v1422_v44, %v1103_v23  ;;  %v1246_v44 = vadd.f32 %v1245_v29, %v1088_v47  ;;  %v1484_v0 = vmax.f32 %v1258_v39, 0.0 }
 0x248   : > { %v1263_v52 = vpop.f32.mrf.mxu0  ;;  %v1424_v42 = vpop.f32.mrf.mxu1  ;;  %v1486_v20 = vmax.f32 %v1419_v53, 0.0  ;;  %v1399_v39 = vadd.f32 %v3783_v16, %v1083_v3  ;;  %v1479_v53 = vmax.f32 %v1250_v36, 0.0  ;;  %v1389_v36 = vadd.f32 %v3771_v15, %v1073_v56 }
 0x249   : > { %v1264_v40 = vadd.f32 %v1263_v52, %v1103_v23  ;;  %v1425_v54 = vadd.f32 %v1424_v42, %v1103_v23  ;;  %v1487_v62 = vmax.f32 %v1262_v14, 0.0  ;;  %v1489_v50 = vmax.f32 %v1423_v41, 0.0  ;;  %v1063_v14 = vpop.permute.xlu0 %1062  ;;  %v1048_v11 = vpop.permute.xlu1 %1047 }
 0x24a   : > { %v1405_v42 = vadd.f32 %v1404_v22, %v1088_v47  ;;  %v1483_v52 = vmax.f32 %v1256_v55, 0.0  ;;  %v1485_v23 = vmax.f32 %v1417_v57, 0.0  ;;  %v1238_v41 = vadd.f32 %v3781_v13, %v1083_v3 }
 0x24b   : > { %v1488_v58 = vmax.f32 %v1264_v40, 0.0  ;;  %v1490_v60 = vmax.f32 %v1425_v54, 0.0  ;;  %v1240_v40 = vadd.f32 %v1239_v17, %v1083_v3  ;;  %v1401_v54 = vadd.f32 %v1400_v24, %v1083_v3 }
 0x24c   : > { %v1234_v55 = vadd.f32 %v3777_v7, %v1078_v46  ;;  %v1395_v57 = vadd.f32 %v3779_v8, %v1078_v46  ;;  %v1475_v13 = vmax.f32 %v1244_v43, 0.0  ;;  %v1477_v17 = vmax.f32 %v1405_v42, 0.0  ;;  %v4785_v42 = vld [vmem:[#allocation16_spill] sm:$0xff] }
 0x24d   : > { %1502 = vmatprep.subr.mxu0 %v1488_v58  ;;  %1573 = vmatprep.subr.mxu1 %v1490_v60  ;;  %v1481_v58 = vmax.f32 %v1411_v35, 0.0  ;;  %v1476_v60 = vmax.f32 %v1246_v44, 0.0  ;;  %v1228_v35 = vadd.f32 %v3769_v51, %v1073_v56  ;;  %v1472_v7 = vmax.f32 %v1240_v40, 0.0  ;;  %v1053_v21 = vpop.permute.xlu0 %1052  ;;  %v4784_v44 = vld [vmem:[#allocation15_spill] sm:$0xff] }
 0x24e   : > { %1503 = vmatpush1.msra.mxu0 %v1487_v62  ;;  %1574 = vmatpush1.msra.mxu1 %v1489_v50  ;;  %v1478_v62 = vmax.f32 %v1407_v61, 0.0  ;;  %v1474_v16 = vmax.f32 %v1401_v54, 0.0  ;;  %v1226_v61 = vadd.f32 %v3765_v2, %v1073_v56  ;;  %v1387_v8 = vadd.f32 %v3767_v12, %v1073_v56 }
 0x24f   : > { %1504 = vmatprep.subr.mxu0 %v1484_v0  ;;  %1575 = vmatprep.subr.mxu1 %v1486_v20  ;;  %v1393_v0 = vadd.f32 %v3775_v59, %v1078_v46  ;;  %v1471_v24 = vmax.f32 %v1238_v41, 0.0  ;;  %v1473_v18 = vmax.f32 %v1399_v39, 0.0  ;;  %v1222_v46 = vadd.f32 %v3761_v32, %v3785_v38 }
 0x250   : > { %1505 = vmatpush1.msra.mxu0 %v1483_v52  ;;  %1576 = vmatpush1.msra.mxu1 %v1485_v23  ;;  %v1383_v51 = vadd.f32 %v3763_v9, %v3785_v38  ;;  %v1468_v59 = vmax.f32 %v1234_v55, 0.0  ;;  %v1470_v15 = vmax.f32 %v1395_v57, 0.0  ;;  %v1220_v2 = vadd.f32 %v3757_v31, %v3785_v38  ;;  %v4786_v23 = vld [vmem:[#allocation17_spill] sm:$0xff]  ;;  %v4789_v55 = vld [vmem:[#allocation20_spill] sm:$0xff] }
 0x251   : > { %1506 = vmatprep.subr.mxu0 %v1480_v28  ;;  %1577 = vmatprep.subr.mxu1 %v1482_v27  ;;  %v1381_v56 = vadd.f32 %v3759_v4, %v3785_v38  ;;  %v1467_v12 = vmax.f32 %v1232_v19, 0.0  ;;  %v1469_v22 = vmax.f32 %v1393_v0, 0.0  ;;  %v1216_v32 = vadd.f32 %v3753_v5, %v1063_v14  ;;  %v4787_v28 = vld [vmem:[#allocation18_spill] sm:$0xff] }
 0x252   : > { %1507 = vmatpush1.msra.mxu0 %v1479_v53  ;;  %1578 = vmatpush1.msra.mxu1 %v1481_v58  ;;  %v1377_v29 = vadd.f32 %v3755_v10, %v1063_v14  ;;  %v1464_v9 = vmax.f32 %v1228_v35, 0.0  ;;  %v1466_v30 = vmax.f32 %v1389_v36, 0.0  ;;  %v1214_v25 = vadd.f32 %v3749_v1, %v1063_v14  ;;  %v1038_v58 = vpop.permute.xlu1 %1037  ;;  %v4791_v0 = vld [vmem:[#allocation22_spill] sm:$0xff] }
 0x253   : > { %1508 = vmatprep.subr.mxu0 %v1476_v60  ;;  %1579 = vmatprep.subr.mxu1 %v1478_v62  ;;  %v1375_v31 = vadd.f32 %v3751_v6, %v1063_v14  ;;  %v1463_v26 = vmax.f32 %v1226_v61, 0.0  ;;  %v1465_v47 = vmax.f32 %v1387_v8, 0.0  ;;  %v1210_v38 = vadd.f32 %v3745_v33, %v1058_v37  ;;  %v4783_v6 = vld [vmem:[#allocation14_spill] sm:$0xff]  ;;  %v4788_v14 = vld [vmem:[#allocation19_spill] sm:$0xff]  ;;  %v4790_v60 = vld [vmem:[#allocation21_spill] sm:$0xff] }
 0x254   : > { %1509 = vmatpush1.msra.mxu0 %v1475_v13  ;;  %1580 = vmatpush1.msra.mxu1 %v1477_v17  ;;  %v1371_v4 = vadd.f32 %v3747_v34, %v1058_v37  ;;  %v1460_v5 = vmax.f32 %v1222_v46, 0.0  ;;  %v1462_v48 = vmax.f32 %v1383_v51, 0.0  ;;  %v1208_v10 = vadd.f32 %v3741_v63, %v1058_v37  ;;  %v1043_v34 = vpop.permute.xlu0 %1042  ;;  %v4792_v17 = vld [vmem:[#allocation23_spill] sm:$0xff]  ;;  %v4794_v8 = vld [vmem:[#allocation25_spill] sm:$0xff]  ;;  %v4795_v51 = vld [vmem:[#allocation26_spill] sm:$0xff] }
 0x255   : > { %1510 = vmatprep.subr.mxu0 %v1472_v7  ;;  %1581 = vmatprep.subr.mxu1 %v1474_v16  ;;  %v1459_v3 = vmax.f32 %v1220_v2, 0.0  ;;  %v1461_v1 = vmax.f32 %v1381_v56, 0.0  ;;  %v1204_v50 = vadd.f32 %v4783_v6, %v1053_v21  ;;  %v1365_v20 = vadd.f32 %v4784_v44, %v1053_v21  ;;  %v4793_v16 = vld [vmem:[#allocation24_spill] sm:$0xff]  ;;  %v4803_v6 = vld [vmem:[#allocation34_spill] sm:$0xff]  ;;  %v4804_v44 = vld [vmem:[#allocation35_spill] sm:$0xff] }
 0x256   : > { %1511 = vmatpush1.msra.mxu0 %v1471_v24  ;;  %1582 = vmatpush1.msra.mxu1 %v1473_v18  ;;  %v1456_v43 = vmax.f32 %v1216_v32, 0.0  ;;  %v1458_v33 = vmax.f32 %v1377_v29, 0.0  ;;  %v1202_v52 = vadd.f32 %v4785_v42, %v1053_v21  ;;  %v1363_v40 = vadd.f32 %v4786_v23, %v1053_v21  ;;  %v4798_v29 = vld [vmem:[#allocation29_spill] sm:$0xff] }
 0x257   : > { %1512 = vmatprep.subr.mxu0 %v1468_v59  ;;  %1583 = vmatprep.subr.mxu1 %v1470_v15  ;;  %v1455_v63 = vmax.f32 %v1214_v25, 0.0  ;;  %v1457_v54 = vmax.f32 %v1375_v31, 0.0  ;;  %v1198_v27 = vadd.f32 %v4787_v28, %v1048_v11  ;;  %v1359_v41 = vadd.f32 %v4788_v14, %v1048_v11  ;;  %v4796_v15 = vld [vmem:[#allocation27_spill] sm:$0xff]  ;;  %v4799_v25 = vld [vmem:[#allocation30_spill] sm:$0xff] }
 0x258   : > { %1513 = vmatpush1.msra.mxu0 %v1467_v12  ;;  %1584 = vmatpush1.msra.mxu1 %v1469_v22  ;;  %v1452_v39 = vmax.f32 %v1210_v38, 0.0  ;;  %v1454_v53 = vmax.f32 %v1371_v4, 0.0  ;;  %v1196_v57 = vadd.f32 %v4789_v55, %v1048_v11  ;;  %v1357_v62 = vadd.f32 %v4790_v60, %v1048_v11  ;;  %v1033_v12 = vpop.permute.xlu0 %1032  ;;  %v4797_v22 = vld [vmem:[#allocation28_spill] sm:$0xff]  ;;  %v1491_v55 = vld [vmem:[%s4610_s5] sm:$0x1] }
 0x259   : > { %1514 = vmatprep.subr.mxu0 %v1464_v9  ;;  %1585 = vmatprep.subr.mxu1 %v1466_v30  ;;  %v1451_v37 = vmax.f32 %v1208_v10, 0.0  ;;  %v1453_v19 = vmax.f32 %v1369_v45, 0.0  ;;  %v1192_v13 = vadd.f32 %v4791_v0, %v1043_v34  ;;  %v1353_v35 = vadd.f32 %v4792_v17, %v1043_v34  ;;  %v4808_v60 = vld [vmem:[#allocation11_spill] sm:$0xff]  ;;  %v3000_v0 = vld [vmem:[%s3229_s10 + $0x8] sm:$0xff]  ;;  %v1680_v17 = vld [vmem:[%s4612_s7 + $0x10] sm:$0xff] }
 0x25a   : > { %1515 = vmatpush1.msra.mxu0 %v1463_v26  ;;  %1586 = vmatpush1.msra.mxu1 %v1465_v47  ;;  %v1448_v36 = vmax.f32 %v1204_v50, 0.0  ;;  %v1450_v7 = vmax.f32 %v1365_v20, 0.0  ;;  %v1190_v61 = vadd.f32 %v4793_v16, %v1043_v34  ;;  %v1351_v24 = vadd.f32 %v4794_v8, %v1043_v34  ;;  %v4800_v26 = vld [vmem:[#allocation31_spill] sm:$0xff]  ;;  %v4805_v34 = vld [vmem:[#allocation36_spill] sm:$0xff]  ;;  %v1684_v16 = vld [vmem:[%s4612_s7 + $0x30] sm:$0xff] }
 0x25b   : > { %1516 = vmatprep.subr.mxu0 %v1460_v5  ;;  %1587 = vmatprep.subr.mxu1 %v1462_v48  ;;  %v1447_v18 = vmax.f32 %v1202_v52, 0.0  ;;  %v1449_v46 = vmax.f32 %v1363_v40, 0.0  ;;  %v1186_v59 = vadd.f32 %v4795_v51, %v1038_v58  ;;  %v1347_v21 = vadd.f32 %v4796_v15, %v1038_v58  ;;  %v1028_v5 = vpop.permute.xlu1 %1027  ;;  %v4801_v48 = vld [vmem:[#allocation32_spill] sm:$0xff]  ;;  %v4806_v52 = vld [vmem:[#allocation37_spill] sm:$0xff] }
 0x25c   : > { %1517 = vmatpush1.msra.mxu0 %v1459_v3  ;;  %1588 = vmatpush1.msra.mxu1 %v1461_v1  ;;  %v1444_v2 = vmax.f32 %v1198_v27, 0.0  ;;  %v1446_v56 = vmax.f32 %v1359_v41, 0.0  ;;  %v1184_v32 = vadd.f32 %v4797_v22, %v1038_v58  ;;  %v1345_v9 = vadd.f32 %v4798_v29, %v1038_v58  ;;  %v3906_v8 = vpop.permute.xlu0 %1731 }
 0x25d   : > { %1518 = vmatprep.subr.mxu0 %v1456_v43  ;;  %1589 = vmatprep.subr.mxu1 %v1458_v33  ;;  %v1443_v30 = vmax.f32 %v1196_v57, 0.0  ;;  %v1445_v11 = vmax.f32 %v1357_v62, 0.0  ;;  %v1180_v31 = vadd.f32 %v4799_v25, %v1033_v12  ;;  %v1341_v47 = vadd.f32 %v4800_v26, %v1033_v12  ;;  %v4807_v57 = vld [vmem:[#allocation10_spill] sm:$0xff]  ;;  %v1678_v62 = vld [vmem:[%s4612_s7] sm:$0xff] }
 0x25e   : > { %1519 = vmatpush1.msra.mxu0 %v1455_v63  ;;  %1590 = vmatpush1.msra.mxu1 %v1457_v54  ;;  %v1440_v38 = vmax.f32 %v1192_v13, 0.0  ;;  %v1442_v4 = vmax.f32 %v1353_v35, 0.0  ;;  %v1178_v10 = vadd.f32 %v4801_v48, %v1033_v12  ;;  %v1339_v45 = vadd.f32 %v4802_v49, %v1033_v12  ;;  %v1679_v13 = vld [vmem:[%s4612_s7 + $0x8] sm:$0xff]  ;;  %v1681_v35 = vld [vmem:[%s4612_s7 + $0x18] sm:$0xff] }
 0x25f   : > { %1520 = vmatprep.subr.mxu0 %v1452_v39  ;;  %1591 = vmatprep.subr.mxu1 %v1454_v53  ;;  %v1439_v3 = vmax.f32 %v1190_v61, 0.0  ;;  %v1441_v1 = vmax.f32 %v1351_v24, 0.0  ;;  %v1174_v50 = vadd.f32 %v4803_v6, %v1028_v5  ;;  %v1335_v20 = vadd.f32 %v4804_v44, %v1028_v5  ;;  %v1685_v61 = vld [vmem:[%s4612_s7 + $0x38] sm:$0xff] }
 0x260   : > { %1521 = vmatpush1.msra.mxu0 %v1451_v37  ;;  %1592 = vmatpush1.msra.mxu1 %v1453_v19  ;;  %v1436_v43 = vmax.f32 %v1186_v59, 0.0  ;;  %v1438_v33 = vmax.f32 %v1347_v21, 0.0  ;;  %v1172_v42 = vadd.f32 %v4805_v34, %v1028_v5  ;;  %v1333_v23 = vadd.f32 %v4806_v52, %v1028_v5  ;;  %v2999_v37 = vld [vmem:[%s3229_s10] sm:$0xff]  ;;  %v3908_v24 = vpop.permute.xlu0 %1721  ;;  %s2620_s10 = scalar_lea.sflag [#allocation5], %s4476_s21 }
 0x261   : > { %1522 = vmatprep.subr.mxu0 %v1448_v36  ;;  %1593 = vmatprep.subr.mxu1 %v1450_v7  ;;  %v1435_v40 = vmax.f32 %v1184_v32, 0.0  ;;  %v1437_v63 = vmax.f32 %v1345_v9, 0.0  ;;  %v1432_v54 = vmax.f32 %v1180_v31, 0.0  ;;  %v1434_v28 = vmax.f32 %v1341_v47, 0.0  ;;  %v1682_v36 = vld [vmem:[%s4612_s7 + $0x20] sm:$0xff]  ;;  %v1683_v7 = vld [vmem:[%s4612_s7 + $0x28] sm:$0xff] }
 0x262   : > { %1523 = vmatpush1.msra.mxu0 %v1447_v18  ;;  %1594 = vmatpush1.msra.mxu1 %v1449_v46  ;;  %v1431_v27 = vmax.f32 %v1178_v10, 0.0  ;;  %v1433_v14 = vmax.f32 %v1339_v45, 0.0  ;;  %v1428_v41 = vmax.f32 %v1174_v50, 0.0  ;;  %v1430_v39 = vmax.f32 %v1335_v20, 0.0  ;;  %v3912_v46 = vpop.permute.xlu1 %1726 }
 0x263   : > { %1524 = vmatprep.subr.mxu0 %v1444_v2  ;;  %1595 = vmatprep.subr.mxu1 %v1446_v56  ;;  %v1427_v53 = vmax.f32 %v1172_v42, 0.0  ;;  %v1429_v58 = vmax.f32 %v1333_v23, 0.0  ;;  %v4809_v19 = vmov 0.0   ;;  %v4624_v51 = vlaneseq }
 0x264   : > { %1525 = vmatpush1.msra.mxu0 %v1443_v30  ;;  %1596 = vmatpush1.msra.mxu1 %v1445_v11  ;;  %v3910_v18 = vpop.permute.xlu0 %1711  ;;  %v3095_v2 = vmov 1966171168  }
 0x265   : > { %1526 = vmatprep.subr.mxu0 %v1440_v38  ;;  %1597 = vmatprep.subr.mxu1 %v1442_v4  ;;  %v3917_v21 = vshrl.u32 %v4624_v51, 7  ;;  %v1651_v56 = vunpack.c.l.s4 %v3095_v2 }
 0x266   : > { %1527 = vmatpush1.msra.mxu0 %v1439_v3  ;;  %1598 = vmatpush1.msra.mxu1 %v1441_v1  ;;  %v3914_v15 = vpop.permute.xlu1 %1716 }
 0x267   : > { %1528 = vmatprep.subr.mxu0 %v1436_v43  ;;  %1599 = vmatprep.subr.mxu1 %v1438_v33  ;;  %4810 = vst [vmem:[#allocation13_spill] sm:$0xff] %v3917_v21  ;;  %v4623_v12 = vsub.s32 0, %v3917_v21  ;;  %v1652_v22 = vunpack.c.0.s8 %v1651_v56 }
 0x268   : > { %1529 = vmatpush1.msra.mxu0 %v1435_v40  ;;  %1600 = vmatpush1.msra.mxu1 %v1437_v63  ;;  %v1702_v59 = vpop.permute.xlu0 %1701 }
 0x269   : > { %1530 = vmatprep.subr.mxu0 %v1432_v54  ;;  %1601 = vmatprep.subr.mxu1 %v1434_v28  ;;  %v3923_v25 = vsub.s32 %v1652_v22, %v3917_v21 }
 0x26a   : > { %1531 = vmatpush1.msra.mxu0 %v1431_v27  ;;  %1602 = vmatpush1.msra.mxu1 %v1433_v14  ;;  %v1707_v29 = vpop.permute.xlu1 %1706 }
 0x26b   : > { %1532 = vmatprep.subr.mxu0 %v1428_v41  ;;  %1603 = vmatprep.subr.mxu1 %v1430_v39  ;;  %4811 = vst [vmem:[#allocation12_spill] sm:$0xff] %v3923_v25 }
 0x26c   : > { %1533 = vmatpush1.msra.mxu0 %v1427_v53  ;;  %1604 = vmatpush1.msra.mxu1 %v1429_v58  ;;  %v1496_v32 = vpop.permute.xlu0 %1495 }
 0x26d   : > { %1567 = vmatmul.mubr.f32.vlgmr.msra.gmra.mxu0 %v1491_v55  ;;  %1638 = vmatmul.mubr.f32.vlgmr.msra.gmra.mxu1 %v1491_v55  ;;  %v1501_v11 = vrot.slane %v1496_v32, %v4623_v12 }
 0x26e   : > { %2788 = vmatprep.subr.msk.mxu0 %vm598_vm0, %v4807_v57  ;;  %2798 = vmatprep.subr.msk.mxu1 %vm598_vm0, %v4808_v60  ;;  %v1697_v49 = vpop.permute.xlu1 %1696 }
 0x26f   : > { %2789 = vmatpush1.msk.msra.mxu0 %vm598_vm0, %v2999_v37  ;;  %1822 = vmatprep.mubr.f32.mxu0 %v4809_v19 }
 0x270   : > { %2799 = vmatpush1.msk.msra.mxu1 %vm598_vm0, %v3000_v0  ;;  %1935 = vmatprep.mubr.f32.mxu1 %v4809_v19 }
 0x271   : > { %2790 = vmatmul.mubr.msk.f32.vlgmr.msra.gmra.mxu0 %vm549_vm1, %v1678_v62  ;;  %2800 = vmatmul.mubr.msk.f32.vlgmr.msra.gmra.mxu1 %vm549_vm1, %v1678_v62 }
 0x272   : > { %1828 = vmatprep.mubr.f32.mxu0 %v4809_v19  ;;  %1941 = vmatprep.mubr.f32.mxu1 %v4809_v19 }
 0x275   : > { %2791 = vmatmul.mubr.msk.f32.gmra.mxu0 %vm549_vm1, %v1679_v13  ;;  %2801 = vmatmul.mubr.msk.f32.gmra.mxu1 %vm549_vm1, %v1679_v13 }
 0x276   : > { %1834 = vmatprep.mubr.f32.mxu0 %v4809_v19  ;;  %1947 = vmatprep.mubr.f32.mxu1 %v4809_v19 }
 0x279   : > { %2792 = vmatmul.mubr.msk.f32.gmra.mxu0 %vm549_vm1, %v1680_v17  ;;  %2802 = vmatmul.mubr.msk.f32.gmra.mxu1 %vm549_vm1, %v1680_v17 }
 0x27a   : > { %1840 = vmatprep.mubr.f32.mxu0 %v4809_v19  ;;  %1953 = vmatprep.mubr.f32.mxu1 %v4809_v19 }
 0x27d   : > { %2793 = vmatmul.mubr.msk.f32.gmra.mxu0 %vm549_vm1, %v1681_v35  ;;  %2803 = vmatmul.mubr.msk.f32.gmra.mxu1 %vm549_vm1, %v1681_v35 }
 0x27e   : > { %1846 = vmatprep.mubr.f32.mxu0 %v4809_v19  ;;  %1959 = vmatprep.mubr.f32.mxu1 %v4809_v19 }
 0x281   : > { %2794 = vmatmul.mubr.msk.f32.gmra.mxu0 %vm549_vm1, %v1682_v36  ;;  %2804 = vmatmul.mubr.msk.f32.gmra.mxu1 %vm549_vm1, %v1682_v36 }
 0x282   : > { %1852 = vmatprep.mubr.f32.mxu0 %v4809_v19  ;;  %1965 = vmatprep.mubr.f32.mxu1 %v4809_v19 }
 0x285   : > { %2795 = vmatmul.mubr.msk.f32.gmra.mxu0 %vm549_vm1, %v1683_v7  ;;  %2805 = vmatmul.mubr.msk.f32.gmra.mxu1 %vm549_vm1, %v1683_v7 }
 0x286   : > { %1858 = vmatprep.mubr.f32.mxu0 %v4809_v19  ;;  %1971 = vmatprep.mubr.f32.mxu1 %v4809_v19 }
 0x289   : > { %2796 = vmatmul.mubr.msk.f32.gmra.mxu0 %vm549_vm1, %v1684_v16  ;;  %2806 = vmatmul.mubr.msk.f32.gmra.mxu1 %vm549_vm1, %v1684_v16 }
 0x28a   : > { %1864 = vmatprep.mubr.f32.mxu0 %v4809_v19  ;;  %1977 = vmatprep.mubr.f32.mxu1 %v4809_v19 }
 0x28d   : > { %2797 = vmatmul.mubr.msk.f32.gmra.mxu0 %vm549_vm1, %v1685_v61  ;;  %2807 = vmatmul.mubr.msk.f32.gmra.mxu1 %vm549_vm1, %v1685_v61 }
 0x28e   : > { %2511 = vmatprep.mubr.f32.mxu0 %v4809_v19  ;;  %2582 = vmatprep.mubr.f32.mxu1 %v4809_v19 }
 0x32d   : > { %v1568_v9 = vpop.f32.mrf.mxu0  ;;  %v1639_v30 = vpop.f32.mrf.mxu1 }
 0x32e   : > { %v1569_v47 = vadd.f32 %v1568_v9, %v1501_v11  ;;  %v1640_v38 = vadd.f32 %v1639_v30, %v1501_v11 }
 0x32f   : > { %v1570_v31 = vpop.f32.mrf.mxu0  ;;  %v1641_v26 = vpop.f32.mrf.mxu1 }
 0x330   : > { %v1571_v4 = vadd.f32 %v1570_v31, %v1501_v11  ;;  %v1642_v5 = vadd.f32 %v1641_v26, %v1501_v11 }
 0x331   : > { %v1824_v48 = vpop.f32.mrf.mxu0  ;;  %v1937_v10 = vpop.f32.mrf.mxu1 }
 0x332   : > { %v1648_v45 = vcombine.low %v1569_v47, %v1571_v4  ;;  %v1649_v3 = vcombine.low %v1640_v38, %v1642_v5  ;;  %v3931_v20 = vadd.f32 %v1824_v48, %v1697_v49  ;;  %v3933_v43 = vadd.f32 %v1937_v10, %v1697_v49 }
 0x333   : > { %v1826_v1 = vpop.f32.mrf.mxu0  ;;  %v1939_v6 = vpop.f32.mrf.mxu1 }
 0x334   : > { %v3926_v50 = vrot.slane %v1648_v45, %v3923_v25  ;;  %v3929_v44 = vrot.slane %v1649_v3, %v3923_v25  ;;  %4814 = vst [vmem:[#allocation16_spill] sm:$0xff] %v3931_v20  ;;  %4815 = vst [vmem:[#allocation17_spill] sm:$0xff] %v3933_v43  ;;  %v3937_v52 = vadd.f32 %v1826_v1, %v1697_v49  ;;  %v2016_v54 = vmin.f32 %v3931_v20, 20.0 }
 0x335   : > { %v1830_v33 = vpop.f32.mrf.mxu0  ;;  %v1943_v34 = vpop.f32.mrf.mxu1  ;;  %v3939_v23 = vadd.f32 %v1939_v6, %v1697_v49  ;;  %v2018_v27 = vmin.f32 %v3933_v43, 20.0 }
 0x336   : > { %4812 = vst [vmem:[#allocation14_spill] sm:$0xff] %v3926_v50  ;;  %4813 = vst [vmem:[#allocation15_spill] sm:$0xff] %v3929_v44  ;;  %v3942_v28 = vadd.f32 %v1830_v33, %v1702_v59  ;;  %v3945_v14 = vadd.f32 %v1943_v34, %v1702_v59  ;;  %v2017_v53 = vmin.f32 %v3937_v52, 20.0  ;;  %v2048_v37 = vmul.f32 1.442695, %v2016_v54 }
 0x337   : > { %4816 = vst [vmem:[#allocation18_spill] sm:$0xff] %v3937_v52  ;;  %4817 = vst [vmem:[#allocation19_spill] sm:$0xff] %v3939_v23  ;;  %v1832_v40 = vpop.f32.mrf.mxu0  ;;  %v1945_v63 = vpop.f32.mrf.mxu1  ;;  %v2019_v55 = vmin.f32 %v3939_v23, 20.0  ;;  %v2052_v13 = vmul.f32 1.442695, %v2018_v27 }
 0x338   : > { %4818 = vst [vmem:[#allocation20_spill] sm:$0xff] %v3942_v28  ;;  %4819 = vst [vmem:[#allocation21_spill] sm:$0xff] %v3945_v14  ;;  %v3948_v58 = vadd.f32 %v1832_v40, %v1702_v59  ;;  %v3951_v57 = vadd.f32 %v1945_v63, %v1702_v59  ;;  %v2020_v19 = vmin.f32 %v3942_v28, 20.0  ;;  %v2022_v17 = vmin.f32 %v3945_v14, 20.0 }
 0x339   : > { %v1836_v41 = vpop.f32.mrf.mxu0  ;;  %v1949_v39 = vpop.f32.mrf.mxu1  ;;  %v2050_v16 = vmul.f32 1.442695, %v2017_v53  ;;  %v2054_v59 = vmul.f32 1.442695, %v2019_v55  ;;  %2871 = vpow2.f32 %v2048_v37 }
 0x33a   : > { %4820 = vst [vmem:[#allocation22_spill] sm:$0xff] %v3948_v58  ;;  %4821 = vst [vmem:[#allocation23_spill] sm:$0xff] %v3951_v57  ;;  %v3954_v0 = vadd.f32 %v1836_v41, %v1707_v29  ;;  %v3957_v35 = vadd.f32 %v1949_v39, %v1707_v29  ;;  %v2021_v61 = vmin.f32 %v3948_v58, 20.0  ;;  %v2023_v56 = vmin.f32 %v3951_v57, 20.0 }
 0x33b   : > { %v1838_v60 = vpop.f32.mrf.mxu0  ;;  %v1951_v62 = vpop.f32.mrf.mxu1  ;;  %v2056_v30 = vmul.f32 1.442695, %v2020_v19  ;;  %2873 = vpow2.f32 %v2052_v13  ;;  %v2060_v31 = vmul.f32 1.442695, %v2022_v17 }
 0x33c   : > { %4822 = vst [vmem:[#allocation24_spill] sm:$0xff] %v3954_v0  ;;  %4823 = vst [vmem:[#allocation25_spill] sm:$0xff] %v3957_v35  ;;  %v3960_v2 = vadd.f32 %v1838_v60, %v1707_v29  ;;  %v3963_v22 = vadd.f32 %v1951_v62, %v1707_v29  ;;  %v2024_v11 = vmin.f32 %v3954_v0, 20.0  ;;  %v2026_v26 = vmin.f32 %v3957_v35, 20.0 }
 0x33d   : > { %v1842_v36 = vpop.f32.mrf.mxu0  ;;  %v1955_v7 = vpop.f32.mrf.mxu1  ;;  %2875 = vpow2.f32 %v2050_v16  ;;  %v2058_v4 = vmul.f32 1.442695, %v2021_v61  ;;  %v2062_v29 = vmul.f32 1.442695, %v2023_v56 }
 0x33e   : > { %4824 = vst [vmem:[#allocation26_spill] sm:$0xff] %v3960_v2  ;;  %4825 = vst [vmem:[#allocation27_spill] sm:$0xff] %v3963_v22  ;;  %v2025_v5 = vmin.f32 %v3960_v2, 20.0  ;;  %2877 = vpow2.f32 %v2054_v59  ;;  %v2027_v48 = vmin.f32 %v3963_v22, 20.0  ;;  %v2064_v45 = vmul.f32 1.442695, %v2024_v11 }
 0x33f   : > { %v1844_v32 = vpop.f32.mrf.mxu0  ;;  %v3965_v9 = vpop.f32.mrf.mxu1  ;;  %2879 = vpow2.f32 %v2056_v30  ;;  %v2068_v1 = vmul.f32 1.442695, %v2026_v26  ;;  %v3982_v53 = vadd.f32 %v1842_v36, %v3910_v18  ;;  %v4001_v59 = vadd.f32 %v1955_v7, %v3910_v18 }
 0x340   : > { %2881 = vpow2.f32 %v2060_v31  ;;  %v2066_v40 = vmul.f32 1.442695, %v2025_v5  ;;  %v2070_v54 = vmul.f32 1.442695, %v2027_v48  ;;  %v4004_v56 = vadd.f32 %v1844_v32, %v3910_v18 }
 0x341   : > { %v1848_v47 = vpop.f32.mrf.mxu0  ;;  %v3969_v38 = vpop.f32.mrf.mxu1  ;;  %2883 = vpow2.f32 %v2058_v4  ;;  %4827 = vst [vmem:[#allocation29_spill] sm:$0xff] %v3982_v53  ;;  %4830 = vst [vmem:[#allocation32_spill] sm:$0xff] %v4001_v59 }
 0x342   : > { %v3974_v3 = vadd.f32 %v1848_v47, %v3914_v15  ;;  %2885 = vpow2.f32 %v2062_v29  ;;  %4831 = vst [vmem:[#allocation33_spill] sm:$0xff] %v4004_v56 }
 0x343   : > { %v1850_v10 = vpop.f32.mrf.mxu0  ;;  %v1963_v49 = vpop.f32.mrf.mxu1  ;;  %2887 = vpow2.f32 %v2064_v45 }
 0x344   : > { %4826 = vst [vmem:[#allocation28_spill] sm:$0xff] %v3974_v3  ;;  %v3977_v6 = vadd.f32 %v1850_v10, %v3914_v15  ;;  %v2032_v63 = vmin.f32 %v3974_v3, 20.0  ;;  %v3985_v60 = vadd.f32 %v1963_v49, %v3914_v15  ;;  %2889 = vpow2.f32 %v2068_v1 }
 0x345   : > { %v1854_v33 = vpop.f32.mrf.mxu0  ;;  %v1967_v34 = vpop.f32.mrf.mxu1  ;;  %2891 = vpow2.f32 %v2066_v40 }
 0x346   : > { %v2033_v27 = vmin.f32 %v3977_v6, 20.0  ;;  %v2080_v55 = vmul.f32 1.442695, %v2032_v63  ;;  %4828 = vst [vmem:[#allocation30_spill] sm:$0xff] %v3985_v60  ;;  %v3988_v37 = vadd.f32 %v1854_v33, %v3908_v24  ;;  %v3991_v19 = vadd.f32 %v1967_v34, %v3908_v24  ;;  %v4009_v5 = vpop.eup %2871 }
 0x347   : > { %v1856_v41 = vpop.f32.mrf.mxu0  ;;  %v1969_v39 = vpop.f32.mrf.mxu1  ;;  %v2035_v16 = vmin.f32 %v3985_v60, 20.0  ;;  %2893 = vpow2.f32 %v2070_v54  ;;  %4832 = vst [vmem:[#allocation34_spill] sm:$0xff] %v4009_v5  ;;  %v2028_v34 = vmin.f32 %v3982_v53, 20.0 }
 0x348   : > { %v2082_v62 = vmul.f32 1.442695, %v2033_v27  ;;  %4829 = vst [vmem:[#allocation31_spill] sm:$0xff] %v3991_v19  ;;  %v3995_v36 = vadd.f32 %v1856_v41, %v3908_v24  ;;  %v3998_v61 = vadd.f32 %v1969_v39, %v3908_v24  ;;  %v2036_v30 = vmin.f32 %v3988_v37, 20.0  ;;  %v4015_v32 = vpop.eup %2873 }
 0x349   : > { %v1860_v13 = vpop.f32.mrf.mxu0  ;;  %v1973_v17 = vpop.f32.mrf.mxu1  ;;  %2895 = vpow2.f32 %v2080_v55  ;;  %v2086_v26 = vmul.f32 1.442695, %v2035_v16  ;;  %v2038_v47 = vmin.f32 %v3991_v19, 20.0  ;;  %4833 = vst [vmem:[#allocation35_spill] sm:$0xff] %v4015_v32  ;;  %v2030_v27 = vmin.f32 %v4001_v59, 20.0 }
 0x34a   : > { %v2037_v4 = vmin.f32 %v3995_v36, 20.0  ;;  %2897 = vpow2.f32 %v2082_v62  ;;  %v2088_v24 = vmul.f32 1.442695, %v2036_v30  ;;  %v2039_v7 = vmin.f32 %v3998_v61, 20.0  ;;  %v4020_v33 = vpop.eup %2875 }
 0x34b   : > { %v1862_v11 = vpop.f32.mrf.mxu0  ;;  %v1975_v31 = vpop.f32.mrf.mxu1  ;;  %v4013_v29 = vadd.f32 %v1860_v13, %v3912_v46  ;;  %2899 = vpow2.f32 %v2086_v26  ;;  %v2092_v48 = vmul.f32 1.442695, %v2038_v47  ;;  %v4018_v49 = vadd.f32 %v1973_v17, %v3912_v46  ;;  %4834 = vst [vmem:[#allocation36_spill] sm:$0xff] %v4020_v33 }
 0x34c   : > { %v2090_v10 = vmul.f32 1.442695, %v2037_v4  ;;  %2901 = vpow2.f32 %v2088_v24  ;;  %v2094_v40 = vmul.f32 1.442695, %v2039_v7  ;;  %v4024_v54 = vpop.eup %2877  ;;  %v4029_v39 = vadd.f32 %v1862_v11, %v3912_v46 }
 0x34d   : > { %v1866_v45 = vpop.f32.mrf.mxu0  ;;  %v1979_v1 = vpop.f32.mrf.mxu1  ;;  %v2040_v63 = vmin.f32 %v4013_v29, 20.0  ;;  %4835 = vst [vmem:[#allocation37_spill] sm:$0xff] %v4024_v54  ;;  %2903 = vpow2.f32 %v2092_v48  ;;  %v2042_v41 = vmin.f32 %v4018_v49, 20.0  ;;  %v4034_v13 = vadd.f32 %v1975_v31, %v3912_v46 }
 0x34e   : > { %v4031_v55 = vpop.eup %2879  ;;  %2905 = vpow2.f32 %v2090_v10  ;;  %v4037_v17 = vadd.f32 %v1866_v45, %v3906_v8  ;;  %v2041_v26 = vmin.f32 %v4029_v39, 20.0  ;;  %v4043_v47 = vadd.f32 %v1979_v1, %v3906_v8 }
 0x34f   : > { %4836 = vst [vmem:[#allocation10_spill] sm:$0xff] %v4031_v55  ;;  %v2096_v62 = vmul.f32 1.442695, %v2040_v63  ;;  %v4039_v16 = vpop.eup %2881  ;;  %2907 = vpow2.f32 %v2094_v40  ;;  %v2100_v30 = vmul.f32 1.442695, %v2042_v41  ;;  %v1868_v11 = vpop.f32.mrf.mxu0  ;;  %v4049_v46 = vadd.f32 %v3965_v9, %v3910_v18 }
 0x350   : > { %4837 = vst [vmem:[#allocation11_spill] sm:$0xff] %v4039_v16  ;;  %v1981_v4 = vpop.f32.mrf.mxu1  ;;  %v4045_v24 = vpop.eup %2883  ;;  %v2043_v31 = vmin.f32 %v4034_v13, 20.0  ;;  %v2044_v7 = vmin.f32 %v4037_v17, 20.0  ;;  %v4057_v10 = vadd.f32 %v3969_v38, %v3914_v15  ;;  %v2098_v45 = vmul.f32 1.442695, %v2041_v26 }
 0x351   : > { %4838 = vst [vmem:[#allocation38_spill] sm:$0xff] %v4045_v24  ;;  %4839 = vst [vmem:[#allocation39_spill] sm:$0xff] %v4049_v46  ;;  %2909 = vpow2.f32 %v2096_v62  ;;  %v4053_v48 = vpop.eup %2885  ;;  %v2046_v1 = vmin.f32 %v4043_v47, 20.0  ;;  %v4063_v9 = vadd.f32 %v1868_v11, %v3906_v8  ;;  %v4066_v41 = vadd.f32 %v1981_v4, %v3906_v8 }
 0x352   : > { %4840 = vst [vmem:[#allocation40_spill] sm:$0xff] %v4053_v48  ;;  %4841 = vst [vmem:[#allocation41_spill] sm:$0xff] %v4057_v10  ;;  %2911 = vpow2.f32 %v2100_v30  ;;  %v4060_v40 = vpop.eup %2887  ;;  %v2102_v63 = vmul.f32 1.442695, %v2043_v31  ;;  %v2104_v18 = vmul.f32 1.442695, %v2044_v7 }
 0x353   : > { %4842 = vst [vmem:[#allocation42_spill] sm:$0xff] %v4060_v40  ;;  %v4068_v62 = vpop.eup %2889  ;;  %v2072_v12 = vmul.f32 1.442695, %v2028_v34  ;;  %v2029_v15 = vmin.f32 %v4004_v56, 20.0  ;;  %2913 = vpow2.f32 %v2098_v45  ;;  %v2108_v38 = vmul.f32 1.442695, %v2046_v1 }
 0x354   : > { %4843 = vst [vmem:[#allocation43_spill] sm:$0xff] %v4068_v62  ;;  %v4071_v30 = vpop.eup %2891  ;;  %v2031_v26 = vmin.f32 %v4049_v46, 20.0  ;;  %2915 = vpow2.f32 %v2102_v63  ;;  %v2045_v31 = vmin.f32 %v4063_v9, 20.0  ;;  %v2047_v11 = vmin.f32 %v4066_v41, 20.0 }
 0x355   : > { %4844 = vst [vmem:[#allocation44_spill] sm:$0xff] %v4071_v30  ;;  %v4076_v7 = vpop.eup %2893  ;;  %v2034_v8 = vmin.f32 %v4057_v10, 20.0  ;;  %2917 = vpow2.f32 %v2104_v18  ;;  %v2076_v34 = vmul.f32 1.442695, %v2030_v27  ;;  %v2074_v51 = vmul.f32 1.442695, %v2029_v15 }
 0x356   : > { %4845 = vst [vmem:[#allocation45_spill] sm:$0xff] %v4076_v7  ;;  %v4079_v4 = vpop.eup %2895  ;;  %2919 = vpow2.f32 %v2108_v38  ;;  %v2106_v45 = vmul.f32 1.442695, %v2045_v31  ;;  %v2110_v1 = vmul.f32 1.442695, %v2047_v11  ;;  %vm2005_vm4 = vcmp.gt.f32.partialorder %v3995_v36, 20.0 }
 0x357   : > { %4846 = vst [vmem:[#allocation46_spill] sm:$0xff] %v4079_v4  ;;  %v4081_v42 = vpop.eup %2897  ;;  %2921 = vpow2.f32 %v2072_v12  ;;  %v2078_v21 = vmul.f32 1.442695, %v2031_v26  ;;  %v2084_v20 = vmul.f32 1.442695, %v2034_v8  ;;  %v4099_v31 = vadd.f32 1.0, %v4079_v4 }
 0x358   : > { %v4083_v63 = vpop.eup %2899  ;;  %2923 = vpow2.f32 %v2106_v45  ;;  %v2265_v27 = vadd.f32 1.0, %v4081_v42  ;;  %vm2008_vm5 = vcmp.gt.f32.partialorder %v4013_v29, 20.0  ;;  %vm2013_vm11 = vcmp.gt.f32.partialorder %v4063_v9, 20.0 }
 0x359   : > { %4847 = vst [vmem:[#allocation47_spill] sm:$0xff] %v4083_v63  ;;  %v4085_v43 = vpop.eup %2901  ;;  %2925 = vpow2.f32 %v2110_v1  ;;  %v4111_v45 = vadd.f32 1.0, %v4083_v63  ;;  %vm2014_vm1 = vcmp.gt.f32.partialorder %v4043_v47, 20.0  ;;  %vm2011_vm10 = vcmp.gt.f32.partialorder %v4034_v13, 20.0 }
 0x35a   : > { %v4087_v23 = vpop.eup %2903  ;;  %2927 = vpow2.f32 %v2076_v34  ;;  %v2292_v26 = vadd.f32 1.0, %v4085_v43  ;;  %v4106_v34 = vmul.f32 -0.5, %v4079_v4  ;;  %v2295_v52 = vmul.f32 -0.5, %v4085_v43 }
 0x35b   : > { %4848 = vst [vmem:[#allocation48_spill] sm:$0xff] %v4087_v23  ;;  %v4089_v18 = vpop.eup %2905  ;;  %2929 = vpow2.f32 %v2074_v51  ;;  %v2268_v51 = vmul.f32 -0.5, %v4081_v42  ;;  %vm2010_vm0 = vcmp.gt.f32.partialorder %v4018_v49, 20.0 }
 0x35c   : > { %v4092_v38 = vpop.eup %2907  ;;  %2931 = vpow2.f32 %v2078_v21  ;;  %v2301_v12 = vadd.f32 1.0, %v4089_v18  ;;  %4849 = vst [vmem:[#allocation49_spill] sm:$0xff] %v4106_v34  ;;  %v4150_v35 = vadd.f32 1.0, %v2295_v52 }
 0x35d   : > { %2933 = vpow2.f32 %v2084_v20  ;;  %v4125_v20 = vadd.f32 1.0, %v4087_v23  ;;  %v4133_v32 = vadd.f32 1.0, %v2268_v51  ;;  %v2319_v54 = vadd.f32 1.0, %v4092_v38 }
 0x35e   : > { %v4095_v15 = vpop.eup %2909  ;;  %2935 = vlog2.f32 %v2301_v12  ;;  %v4117_v12 = vmul.f32 -0.5, %v4083_v63  ;;  %v4146_v51 = vmul.f32 -0.5, %v4092_v38 }
 0x35f   : > { %v4101_v11 = vpop.eup %2911  ;;  %v2328_v8 = vadd.f32 1.0, %v4095_v15  ;;  %2937 = vlog2.f32 %v2265_v27  ;;  %v2307_v27 = vand.u32 2147483647, %v4089_v18  ;;  %v2331_v5 = vmul.f32 -0.5, %v4095_v15 }
 0x360   : > { %v2346_v21 = vadd.f32 1.0, %v4101_v11  ;;  %v4113_v1 = vpop.eup %2913  ;;  %4850 = vst [vmem:[#allocation50_spill] sm:$0xff] %v4117_v12  ;;  %v2334_v33 = vand.u32 2147483647, %v4095_v15  ;;  %v2352_v59 = vand.u32 2147483647, %v4101_v11 }
 0x361   : > { %2939 = vlog2.f32 %v2328_v8  ;;  %v4120_v28 = vpop.eup %2915  ;;  %v2337_v44 = vadd.f32 1.0, %v4113_v1  ;;  %v4130_v8 = vmul.f32 -0.5, %v4087_v23  ;;  %v2340_v62 = vmul.f32 -0.5, %v4113_v1 }
 0x362   : > { %2941 = vlog2.f32 %v2292_v26  ;;  %v4127_v50 = vpop.eup %2917  ;;  %v2304_v26 = vmul.f32 -0.5, %v4089_v18  ;;  %v2355_v48 = vadd.f32 1.0, %v4120_v28  ;;  %v2332_v46 = vadd.f32 1.0, %v2331_v5 }
 0x363   : > { %2943 = vlog2.f32 %v2346_v21  ;;  %v4135_v14 = vpop.eup %2919  ;;  %v2364_v57 = vadd.f32 1.0, %v4127_v50  ;;  %v2367_v0 = vmul.f32 -0.5, %v4127_v50  ;;  %v2370_v53 = vand.u32 2147483647, %v4127_v50 }
 0x364   : > { %2945 = vlog2.f32 %v2337_v44  ;;  %v4140_v58 = vpop.eup %2921  ;;  %v2382_v21 = vadd.f32 1.0, %v4135_v14  ;;  %v2385_v52 = vmul.f32 -0.5, %v4135_v14  ;;  %vm4169_vm2 = vcmp.lt.f32.partialorder %v2307_v27, 0.0004427343 }
 0x365   : > { %4851 = vst [vmem:[#allocation51_spill] sm:$0xff] %v4140_v58  ;;  %v2924_v25 = vpop.eup %2923  ;;  %2947 = vlog2.f32 %v2364_v57  ;;  %v2349_v57 = vmul.f32 -0.5, %v4101_v11  ;;  %v2368_v30 = vadd.f32 1.0, %v2367_v0  ;;  %v2358_v60 = vmul.f32 -0.5, %v4120_v28 }
 0x366   : > { %v4152_v16 = vpop.eup %2925  ;;  %v2373_v55 = vadd.f32 1.0, %v2924_v25  ;;  %2949 = vlog2.f32 %v2382_v21  ;;  %v2376_v2 = vmul.f32 -0.5, %v2924_v25  ;;  %vm4177_vm3 = vcmp.lt.f32.partialorder %v2334_v33, 0.0004427343 }
 0x367   : > { %v4156_v22 = vpop.eup %2927  ;;  %v2391_v24 = vadd.f32 1.0, %v4152_v16  ;;  %v2394_v56 = vmul.f32 -0.5, %v4152_v16  ;;  %v2379_v10 = vand.u32 2147483647, %v2924_v25  ;;  %v2388_v27 = vand.u32 2147483647, %v4135_v14 }
 0x368   : > { %4852 = vst [vmem:[#allocation52_spill] sm:$0xff] %v4156_v22  ;;  %v4161_v44 = vpop.eup %2929  ;;  %2951 = vlog2.f32 %v2373_v55  ;;  %v2343_v55 = vand.u32 2147483647, %v4113_v1  ;;  %v2377_v22 = vadd.f32 1.0, %v2376_v2  ;;  %v2305_v63 = vadd.f32 1.0, %v2304_v26 }
 0x369   : > { %4853 = vst [vmem:[#allocation53_spill] sm:$0xff] %v4161_v44  ;;  %v4165_v21 = vpop.eup %2931  ;;  %2953 = vlog2.f32 %v2391_v24  ;;  %v2397_v19 = vand.u32 2147483647, %v4152_v16  ;;  %v2386_v0 = vadd.f32 1.0, %v2385_v52  ;;  %v2341_v3 = vadd.f32 1.0, %v2340_v62 }
 0x36a   : > { %4854 = vst [vmem:[#allocation54_spill] sm:$0xff] %v4165_v21  ;;  %v4173_v7 = vpop.eup %2933  ;;  %2955 = vlog2.f32 %v2355_v48  ;;  %v2395_v33 = vadd.f32 1.0, %v2394_v56  ;;  %vm4187_vm6 = vcmp.lt.f32.partialorder %v2370_v53, 0.0004427343  ;;  %v2361_v2 = vand.u32 2147483647, %v4120_v28 }
 0x36b   : > { %v2936_v24 = vpop.eup %2935  ;;  %2957 = vlog2.f32 %v2319_v54  ;;  %v2333_v26 = vmul.f32 %v4095_v15, %v2332_v46  ;;  %v4194_v34 = vmul.f32 %v4127_v50, %v2368_v30  ;;  %vm4196_vm7 = vcmp.lt.f32.partialorder %v2343_v55, 0.0004427343  ;;  %v4888_v15 = vld [vmem:[#allocation50_spill] sm:$0xff] }
 0x36c   : > { %v4182_v4 = vpop.eup %2937  ;;  %v2359_v54 = vadd.f32 1.0, %v2358_v60  ;;  %v2350_v52 = vadd.f32 1.0, %v2349_v57  ;;  %v2303_v12 = vmul.f32 0.6931472, %v2936_v24  ;;  %v2378_v53 = vmul.f32 %v2924_v25, %v2377_v22 }
 0x36d   : > { %vm4200_vm8 = vcmp.lt.f32.partialorder %v2379_v10, 0.0004427343  ;;  %vm4204_vm9 = vcmp.lt.f32.partialorder %v2388_v27, 0.0004427343  ;;  %vm4210_vm12 = vcmp.lt.f32.partialorder %v2397_v19, 0.0004427343  ;;  %v4215_v25 = vmul.f32 %v4135_v14, %v2386_v0 }
 0x36e   : > { %v2940_v48 = vpop.eup %2939  ;;  %v4218_v22 = vmul.f32 %v4113_v1, %v2341_v3  ;;  %v2306_v10 = vmul.f32 %v4089_v18, %v2305_v63  ;;  %2959 = vlog2.f32 %v4125_v20  ;;  %v2396_v30 = vmul.f32 %v4152_v16, %v2395_v33 }
 0x36f   : > { %v2942_v21 = vpop.eup %2941  ;;  %v2330_v46 = vmul.f32 0.6931472, %v2940_v48  ;;  %vm4224_vm14 = vcmp.lt.f32.partialorder %v2361_v2, 0.0004427343  ;;  %vm4228_vm15 = vcmp.lt.f32.partialorder %v2352_v59, 0.0004427343  ;;  %v2360_v16 = vmul.f32 %v4120_v28, %v2359_v54 }
 0x370   : > { %v2944_v56 = vpop.eup %2943  ;;  %v2323_v14 = vadd.f32 1.0, %v4146_v51  ;;  %v2294_v3 = vmul.f32 0.6931472, %v2942_v21  ;;  %v2351_v63 = vmul.f32 %v4101_v11, %v2350_v52  ;;  %v2309_v59 = vsel %vm4169_vm2, %v2306_v10, %v2303_v12  ;;  %v4887_v10 = vld [vmem:[#allocation48_spill] sm:$0xff] }
 0x371   : > { %v2946_v50 = vpop.eup %2945  ;;  %v2297_v18 = vmul.f32 %v4085_v43, %v4150_v35  ;;  %v2336_v21 = vsel %vm4177_vm3, %v2333_v26, %v2330_v46  ;;  %v2348_v55 = vmul.f32 0.6931472, %v2944_v56  ;;  %v4873_v11 = vand.u32 2147483647, %v4092_v38 }
 0x372   : > { %v2948_v1 = vpop.eup %2947  ;;  %v2339_v57 = vmul.f32 0.6931472, %v2946_v50  ;;  %v4876_v35 = vand.u32 2147483647, %v4085_v43  ;;  %2961 = vlog2.f32 %v4111_v45  ;;  %v2421_v24 = vsel %vm2005_vm4, %v3995_v36, %v2309_v59  ;;  %v4891_v59 = vld [vmem:[#allocation54_spill] sm:$0xff] }
 0x373   : > { %v2950_v20 = vpop.eup %2949  ;;  %v2366_v51 = vmul.f32 0.6931472, %v2948_v1  ;;  %vm4248_vm13 = vcmp.lt.f32.partialorder %v4873_v11, 0.0004427343  ;;  %vm2007_vm3 = vcmp.gt.f32.partialorder %v3998_v61, 20.0  ;;  %v2324_v27 = vmul.f32 %v4092_v38, %v2323_v14 }
 0x374   : > { %v2384_v28 = vmul.f32 0.6931472, %v2950_v20  ;;  %vm4254_vm2 = vcmp.lt.f32.partialorder %v4876_v35, 0.0004427343  ;;  %2963 = vlog2.f32 %v4099_v31  ;;  %v2424_v33 = vsel %vm2008_vm5, %v4013_v29, %v2336_v21  ;;  %v4892_v20 = vld [vmem:[#allocation51_spill] sm:$0xff] }
 0x375   : > { %v2952_v5 = vpop.eup %2951  ;;  %v2300_v0 = vsel %vm4254_vm2, %v2297_v18, %v2294_v3  ;;  %v2372_v45 = vsel %vm4187_vm6, %v4194_v34, %v2366_v51  ;;  %v2314_v36 = vadd.f32 1.0, %v4130_v8  ;;  %vm2001_vm4 = vcmp.gt.f32.partialorder %v3977_v6, 20.0  ;;  %v4896_v35 = vld [vmem:[#allocation47_spill] sm:$0xff] }
 0x376   : > { %v2954_v43 = vpop.eup %2953  ;;  %v2375_v48 = vmul.f32 0.6931472, %v2952_v5  ;;  %v2345_v31 = vsel %vm4196_vm7, %v4218_v22, %v2339_v57  ;;  %v2354_v26 = vsel %vm4228_vm15, %v2351_v63, %v2348_v55  ;;  %v2267_v58 = vmul.f32 0.6931472, %v4182_v4  ;;  %v4893_v57 = vld [vmem:[#allocation28_spill] sm:$0xff]  ;;  %v4895_v55 = vld [vmem:[#allocation46_spill] sm:$0xff] }
 0x377   : > { %v2956_v38 = vpop.eup %2955  ;;  %v2393_v2 = vmul.f32 0.6931472, %v2954_v43  ;;  %v2390_v29 = vsel %vm4204_vm9, %v4215_v25, %v2384_v28  ;;  %v2274_v54 = vadd.f32 1.0, %v4173_v7  ;;  %vm4879_vm5 = vcmp.gt.f32.partialorder %v4037_v17, 20.0  ;;  %v4886_v25 = vld [vmem:[#allocation53_spill] sm:$0xff] }
 0x378   : > { %v2381_v34 = vsel %vm4200_vm8, %v2378_v53, %v2375_v48  ;;  %v2357_v8 = vmul.f32 0.6931472, %v2956_v38  ;;  %v2958_v52 = vpop.eup %2957  ;;  %v2428_v23 = vsel %vm4879_vm5, %v4037_v17, %v2372_v45  ;;  %v2270_v4 = vmul.f32 %v4081_v42, %v4133_v32  ;;  %v4901_v38 = vld [vmem:[#allocation52_spill] sm:$0xff] }
 0x379   : > { %v2429_v62 = vsel %vm2013_vm11, %v4063_v9, %v2381_v34  ;;  %v2399_v56 = vsel %vm4210_vm12, %v2396_v30, %v2393_v2  ;;  %vm4880_vm6 = vcmp.gt.f32.partialorder %v4066_v41, 20.0  ;;  %v2321_v46 = vmul.f32 0.6931472, %v2958_v52 }
 0x37a   : > { %2463 = vmatprep.subr.mxu0 %v2429_v62  ;;  %v2431_v44 = vsel %vm4880_vm6, %v4066_v41, %v2399_v56  ;;  %v2363_v53 = vsel %vm4224_vm14, %v2360_v16, %v2357_v8  ;;  %2965 = vlog2.f32 %v2274_v54  ;;  %v2430_v9 = vsel %vm2014_vm1, %v4043_v47, %v2390_v29  ;;  %v4903_v56 = vld [vmem:[#allocation44_spill] sm:$0xff] }
 0x37b   : > { %2534 = vmatprep.subr.mxu1 %v2431_v44  ;;  %2464 = vmatpush1.msra.mxu0 %v2428_v23  ;;  %vm4881_vm7 = vcmp.gt.f32.partialorder %v4029_v39, 20.0  ;;  %vm4882_vm8 = vcmp.gt.f32.partialorder %v3988_v37, 20.0  ;;  %v4883_v41 = vand.u32 2147483647, %v4081_v42  ;;  %v2427_v47 = vsel %vm2011_vm10, %v4034_v13, %v2363_v53  ;;  %v2960_v22 = vpop.eup %2959  ;;  %v4889_v13 = vld [vmem:[#allocation49_spill] sm:$0xff] }
 0x37c   : > { %v2425_v32 = vsel %vm4881_vm7, %v4029_v39, %v2345_v31  ;;  %v2420_v17 = vsel %vm4882_vm8, %v3988_v37, %v2300_v0  ;;  %2535 = vmatpush1.msra.mxu1 %v2430_v9  ;;  %v2327_v60 = vsel %vm4248_vm13, %v2324_v27, %v2321_v46  ;;  %v2229_v37 = vadd.f32 1.0, %v4886_v25  ;;  %v4900_v27 = vld [vmem:[#allocation41_spill] sm:$0xff]  ;;  %v4902_v31 = vld [vmem:[#allocation30_spill] sm:$0xff] }
 0x37d   : > { %vm4313_vm9 = vcmp.lt.f32.partialorder %v4883_v41, 0.0004427343  ;;  %2465 = vmatprep.subr.mxu0 %v2425_v32  ;;  %2536 = vmatprep.subr.mxu1 %v2427_v47  ;;  %v2426_v42 = vsel %vm2010_vm0, %v4018_v49, %v2354_v26  ;;  %v2315_v30 = vmul.f32 %v4887_v10, %v2314_v36  ;;  %v2287_v19 = vadd.f32 1.0, %v4888_v15  ;;  %v4906_v9 = vld [vmem:[#allocation45_spill] sm:$0xff] }
 0x37e   : > { %v2273_v39 = vsel %vm4313_vm9, %v2270_v4, %v2267_v58  ;;  %2466 = vmatpush1.msra.mxu0 %v2424_v33  ;;  %v2260_v14 = vadd.f32 1.0, %v4889_v13  ;;  %2537 = vmatpush1.msra.mxu1 %v2426_v42  ;;  %v2423_v3 = vsel %vm2007_vm3, %v3998_v61, %v2327_v60  ;;  %v2312_v1 = vmul.f32 0.6931472, %v2960_v22  ;;  %v4894_v61 = vld [vmem:[#allocation31_spill] sm:$0xff]  ;;  %v4907_v60 = vld [vmem:[#allocation42_spill] sm:$0xff]  ;;  %v4909_v42 = vld [vmem:[#allocation33_spill] sm:$0xff] }
 0x37f   : > { %2467 = vmatprep.subr.mxu0 %v2421_v24  ;;  %v2277_v16 = vmul.f32 -0.5, %v4173_v7  ;;  %2967 = vlog2.f32 %v2229_v37  ;;  %2538 = vmatprep.subr.mxu1 %v2423_v3  ;;  %v4890_v49 = vand.u32 2147483647, %v4887_v10  ;;  %v2417_v63 = vsel %vm2001_vm4, %v3977_v6, %v2273_v39  ;;  %v2962_v11 = vpop.eup %2961  ;;  %v4908_v37 = vld [vmem:[#allocation29_spill] sm:$0xff] }
 0x380   : > { %2468 = vmatpush1.msra.mxu0 %v2420_v17  ;;  %v2247_v18 = vadd.f32 1.0, %v4891_v59  ;;  %v2220_v51 = vadd.f32 1.0, %v4892_v20  ;;  %vm2000_vm11 = vcmp.gt.f32.partialorder %v4893_v57, 20.0  ;;  %vm2006_vm12 = vcmp.gt.f32.partialorder %v4894_v61, 20.0 }
 0x381   : > { %vm2317_vm10 = vcmp.lt.f32.partialorder %v4890_v49, 0.0004427343  ;;  %2469 = vmatprep.subr.mxu0 %v2417_v63  ;;  %v2262_v28 = vand.u32 2147483647, %v4895_v55  ;;  %v2288_v12 = vmul.f32 %v4896_v35, %v2287_v19  ;;  %v4897_v5 = vand.u32 2147483647, %v4896_v35  ;;  %v2964_v24 = vpop.eup %2963 }
 0x382   : > { %v2318_v21 = vsel %vm2317_vm10, %v2315_v30, %v2312_v1  ;;  %2969 = vlog2.f32 %v2247_v18  ;;  %vm2002_vm14 = vcmp.gt.f32.partialorder %v4900_v27, 20.0  ;;  %v2285_v0 = vmul.f32 0.6931472, %v2962_v11  ;;  %v4912_v30 = vld [vmem:[#allocation39_spill] sm:$0xff]  ;;  %v4916_v18 = vld [vmem:[#allocation32_spill] sm:$0xff]  ;;  %v4919_v11 = vld [vmem:[#allocation38_spill] sm:$0xff] }
 0x383   : > { %v2422_v40 = vsel %vm2006_vm12, %v4894_v61, %v2318_v21  ;;  %vm4349_vm13 = vcmp.lt.f32.partialorder %v4897_v5, 0.0004427343  ;;  %v2261_v43 = vmul.f32 %v4895_v55, %v2260_v14  ;;  %v2278_v48 = vadd.f32 1.0, %v2277_v16  ;;  %v4915_v49 = vld [vmem:[#allocation43_spill] sm:$0xff] }
 0x384   : > { %2539 = vmatpush1.msra.mxu1 %v2422_v40  ;;  %2971 = vlog2.f32 %v2220_v51  ;;  %v2258_v45 = vmul.f32 0.6931472, %v2964_v24  ;;  %v2280_v33 = vand.u32 2147483647, %v4173_v7  ;;  %v2232_v36 = vmul.f32 -0.5, %v4886_v25  ;;  %v4922_v24 = vld [vmem:[#allocation26_spill] sm:$0xff] }
 0x385   : > { %v2238_v2 = vadd.f32 1.0, %v4901_v38  ;;  %vm2003_vm15 = vcmp.gt.f32.partialorder %v4902_v31, 20.0  ;;  %v2291_v26 = vsel %vm4349_vm13, %v2288_v12, %v2285_v0  ;;  %vm2263_vm0 = vcmp.lt.f32.partialorder %v2262_v28, 0.0004427343 }
 0x386   : > { %v2250_v58 = vmul.f32 -0.5, %v4891_v59  ;;  %v2419_v34 = vsel %vm2003_vm15, %v4902_v31, %v2291_v26  ;;  %v2264_v29 = vsel %vm2263_vm0, %v2261_v43, %v2258_v45  ;;  %v2223_v8 = vmul.f32 -0.5, %v4892_v20  ;;  %v4923_v45 = vld [vmem:[#allocation27_spill] sm:$0xff] }
 0x387   : > { %2973 = vlog2.f32 %v2238_v2  ;;  %2540 = vmatprep.subr.mxu1 %v2419_v34  ;;  %v2416_v54 = vsel %vm2000_vm11, %v4893_v57, %v2264_v29  ;;  %v2279_v52 = vmul.f32 %v4173_v7, %v2278_v48  ;;  %v2235_v62 = vand.u32 2147483647, %v4886_v25  ;;  %v2966_v4 = vpop.eup %2965  ;;  %v4925_v34 = vld [vmem:[#allocation24_spill] sm:$0xff] }
 0x388   : > { %v2193_v23 = vadd.f32 1.0, %v4903_v56  ;;  %2470 = vmatpush1.msra.mxu0 %v2416_v54  ;;  %vm4370_vm1 = vcmp.lt.f32.partialorder %v2280_v33, 0.0004427343  ;;  %v2233_v53 = vadd.f32 1.0, %v2232_v36  ;;  %v2241_v46 = vmul.f32 -0.5, %v4901_v38  ;;  %v4924_v33 = vld [vmem:[#allocation40_spill] sm:$0xff] }
 0x389   : > { %v2211_v32 = vadd.f32 1.0, %v4906_v9  ;;  %v2276_v17 = vmul.f32 0.6931472, %v2966_v4  ;;  %v2253_v41 = vand.u32 2147483647, %v4891_v59  ;;  %v2251_v50 = vadd.f32 1.0, %v2250_v58 }
 0x38a   : > { %v2226_v7 = vand.u32 2147483647, %v4892_v20  ;;  %2975 = vlog2.f32 %v2193_v23  ;;  %v2224_v47 = vadd.f32 1.0, %v2223_v8  ;;  %v2184_v39 = vadd.f32 1.0, %v4907_v60  ;;  %v4928_v4 = vld [vmem:[#allocation10_spill] sm:$0xff] }
 0x38b   : > { %2977 = vlog2.f32 %v2211_v32  ;;  %vm1996_vm2 = vcmp.gt.f32.partialorder %v4908_v37, 20.0  ;;  %v2282_v22 = vsel %vm4370_vm1, %v2279_v52, %v2276_v17  ;;  %vm1997_vm3 = vcmp.gt.f32.partialorder %v4909_v42, 20.0  ;;  %v4941_v52 = vld [vmem:[#allocation35_spill] sm:$0xff] }
 0x38c   : > { %vm4383_vm4 = vcmp.lt.f32.partialorder %v2235_v62, 0.0004427343  ;;  %vm1999_vm5 = vcmp.gt.f32.partialorder %v4912_v30, 20.0  ;;  %v2968_v15 = vpop.eup %2967  ;;  %v2418_v19 = vsel %vm2002_vm14, %v4900_v27, %v2282_v22  ;;  %v2242_v13 = vadd.f32 1.0, %v2241_v46 }
 0x38d   : > { %v2244_v14 = vand.u32 2147483647, %v4901_v38  ;;  %2979 = vlog2.f32 %v2184_v39  ;;  %2541 = vmatpush1.msra.mxu1 %v2418_v19  ;;  %v2231_v3 = vmul.f32 0.6931472, %v2968_v15  ;;  %v2234_v1 = vmul.f32 %v4886_v25, %v2233_v53 }
 0x38e   : > { %vm4393_vm6 = vcmp.lt.f32.partialorder %v2253_v41, 0.0004427343  ;;  %v2202_v63 = vadd.f32 1.0, %v4915_v49  ;;  %vm1998_vm7 = vcmp.gt.f32.partialorder %v4916_v18, 20.0  ;;  %v2252_v51 = vmul.f32 %v4891_v59, %v2251_v50  ;;  %v4929_v41 = vld [vmem:[#allocation11_spill] sm:$0xff] }
 0x38f   : > { %v2225_v57 = vmul.f32 %v4892_v20, %v2224_v47  ;;  %vm4401_vm8 = vcmp.lt.f32.partialorder %v2226_v7, 0.0004427343  ;;  %v2196_v21 = vmul.f32 -0.5, %v4903_v56  ;;  %v2970_v55 = vpop.eup %2969  ;;  %v2237_v25 = vsel %vm4383_vm4, %v2234_v1, %v2231_v3  ;;  %v4930_v47 = vld [vmem:[#allocation25_spill] sm:$0xff] }
 0x390   : > { %v2214_v28 = vmul.f32 -0.5, %v4906_v9  ;;  %2981 = vlog2.f32 %v2202_v63  ;;  %v2157_v40 = vadd.f32 1.0, %v4919_v11  ;;  %v2413_v59 = vsel %vm1997_vm3, %v4909_v42, %v2237_v25 }
 0x391   : > { %v2972_v35 = vpop.eup %2971  ;;  %v2249_v20 = vmul.f32 0.6931472, %v2970_v55  ;;  %v2243_v12 = vmul.f32 %v4901_v38, %v2242_v13  ;;  %vm4414_vm9 = vcmp.lt.f32.partialorder %v2244_v14, 0.0004427343  ;;  %2471 = vmatprep.subr.mxu0 %v2413_v59  ;;  %vm1993_vm10 = vcmp.gt.f32.partialorder %v4922_v24, 20.0  ;;  %v4934_v55 = vld [vmem:[#allocation37_spill] sm:$0xff] }
 0x392   : > { %v2222_v6 = vmul.f32 0.6931472, %v2972_v35  ;;  %v2199_v27 = vand.u32 2147483647, %v4903_v56  ;;  %v2187_v0 = vmul.f32 -0.5, %v4907_v60  ;;  %2983 = vlog2.f32 %v2157_v40 }
 0x393   : > { %v2255_v43 = vsel %vm4393_vm6, %v2252_v51, %v2249_v20  ;;  %v2197_v48 = vadd.f32 1.0, %v2196_v21  ;;  %vm1995_vm11 = vcmp.gt.f32.partialorder %v4923_v45, 20.0  ;;  %v2175_v36 = vadd.f32 1.0, %v4924_v33 }
 0x394   : > { %v2974_v38 = vpop.eup %2973  ;;  %v2415_v2 = vsel %vm1999_vm5, %v4912_v30, %v2255_v43  ;;  %v2228_v31 = vsel %vm4401_vm8, %v2225_v57, %v2222_v6  ;;  %v2215_v26 = vadd.f32 1.0, %v2214_v28  ;;  %v2217_v58 = vand.u32 2147483647, %v4906_v9 }
 0x395   : > { %vm1992_vm12 = vcmp.gt.f32.partialorder %v4925_v34, 20.0  ;;  %2542 = vmatprep.subr.mxu1 %v2415_v2  ;;  %v2412_v29 = vsel %vm1996_vm2, %v4908_v37, %v2228_v31  ;;  %v2240_v8 = vmul.f32 0.6931472, %v2974_v38  ;;  %v2205_v54 = vmul.f32 -0.5, %v4915_v49 }
 0x396   : > { %2985 = vlog2.f32 %v2175_v36  ;;  %2472 = vmatpush1.msra.mxu0 %v2412_v29  ;;  %vm4436_vm13 = vcmp.lt.f32.partialorder %v2199_v27, 0.0004427343  ;;  %v2188_v62 = vadd.f32 1.0, %v2187_v0  ;;  %v2160_v23 = vmul.f32 -0.5, %v4919_v11  ;;  %v4935_v27 = vld [vmem:[#allocation34_spill] sm:$0xff] }
 0x397   : > { %v2148_v44 = vadd.f32 1.0, %v4928_v4  ;;  %v2976_v53 = vpop.eup %2975  ;;  %v2246_v46 = vsel %vm4414_vm9, %v2243_v12, %v2240_v8  ;;  %v2198_v32 = vmul.f32 %v4903_v56, %v2197_v48  ;;  %v2190_v17 = vand.u32 2147483647, %v4907_v60  ;;  %v4936_v48 = vld [vmem:[#allocation22_spill] sm:$0xff]  ;;  %v4940_v8 = vld [vmem:[#allocation23_spill] sm:$0xff] }
 0x398   : > { %v2166_v7 = vadd.f32 1.0, %v4929_v41  ;;  %v2978_v50 = vpop.eup %2977  ;;  %vm1994_vm14 = vcmp.gt.f32.partialorder %v4930_v47, 20.0  ;;  %v2414_v39 = vsel %vm1998_vm7, %v4916_v18, %v2246_v46  ;;  %v2195_v37 = vmul.f32 0.6931472, %v2976_v53 }
 0x399   : > { %v2208_v22 = vand.u32 2147483647, %v4915_v49  ;;  %2987 = vlog2.f32 %v2148_v44  ;;  %2543 = vmatpush1.msra.mxu1 %v2414_v39  ;;  %v2213_v42 = vmul.f32 0.6931472, %v2978_v50  ;;  %v2216_v10 = vmul.f32 %v4906_v9, %v2215_v26 }
 0x39a   : > { %vm2218_vm15 = vcmp.lt.f32.partialorder %v2217_v58, 0.0004427343  ;;  %v2206_v56 = vadd.f32 1.0, %v2205_v54  ;;  %v2980_v30 = vpop.eup %2979  ;;  %v2201_v15 = vsel %vm4436_vm13, %v2198_v32, %v2195_v37  ;;  %v2189_v19 = vmul.f32 %v4907_v60, %v2188_v62  ;;  %v4933_v60 = vld [vmem:[#allocation36_spill] sm:$0xff] }
 0x39b   : > { %v2161_v13 = vadd.f32 1.0, %v2160_v23  ;;  %2989 = vlog2.f32 %v2166_v7  ;;  %v2409_v14 = vsel %vm1993_vm10, %v4922_v24, %v2201_v15  ;;  %v2219_v3 = vsel %vm2218_vm15, %v2216_v10, %v2213_v42  ;;  %v4942_v32 = vld [vmem:[#allocation12_spill] sm:$0xff]  ;;  %v4944_v7 = vld [vmem:[#allocation15_spill] sm:$0xff] }
 0x39c   : > { %v2186_v1 = vmul.f32 0.6931472, %v2980_v30  ;;  %v2178_v16 = vmul.f32 -0.5, %v4924_v33  ;;  %2473 = vmatprep.subr.mxu0 %v2409_v14  ;;  %v2411_v9 = vsel %vm1995_vm11, %v4923_v45, %v2219_v3  ;;  %vm2191_vm0 = vcmp.lt.f32.partialorder %v2190_v17, 0.0004427343  ;;  %v4943_v17 = vld [vmem:[#allocation14_spill] sm:$0xff] }
 0x39d   : > { %vm4463_vm1 = vcmp.lt.f32.partialorder %v2208_v22, 0.0004427343  ;;  %v2121_v18 = vadd.f32 1.0, %v4933_v60  ;;  %v2982_v51 = vpop.eup %2981  ;;  %2544 = vmatprep.subr.mxu1 %v2411_v9  ;;  %v2207_v61 = vmul.f32 %v4915_v49, %v2206_v56  ;;  %v2163_v21 = vand.u32 2147483647, %v4919_v11  ;;  %v4946_v42 = vld [vmem:[#allocation20_spill] sm:$0xff] }
 0x39e   : > { %v2192_v57 = vsel %vm2191_vm0, %v2189_v19, %v2186_v1  ;;  %v2139_v25 = vadd.f32 1.0, %v4934_v55  ;;  %v2204_v40 = vmul.f32 0.6931472, %v2982_v51  ;;  %v2151_v35 = vmul.f32 -0.5, %v4928_v4  ;;  %v4947_v3 = vld [vmem:[#allocation21_spill] sm:$0xff] }
 0x39f   : > { %v2408_v28 = vsel %vm1992_vm12, %v4925_v34, %v2192_v57  ;;  %2991 = vlog2.f32 %v2121_v18  ;;  %v2984_v59 = vpop.eup %2983  ;;  %v2162_v20 = vmul.f32 %v4919_v11, %v2161_v13  ;;  %v2179_v49 = vadd.f32 1.0, %v2178_v16 }
 0x3a0   : > { %2474 = vmatpush1.msra.mxu0 %v2408_v28  ;;  %v2169_v12 = vmul.f32 -0.5, %v4929_v41  ;;  %2993 = vlog2.f32 %v2139_v25  ;;  %v2210_v5 = vsel %vm4463_vm1, %v2207_v61, %v2204_v40  ;;  %v2159_v6 = vmul.f32 0.6931472, %v2984_v59  ;;  %v4948_v40 = vld [vmem:[#allocation18_spill] sm:$0xff] }
 0x3a1   : > { %v2181_v24 = vand.u32 2147483647, %v4924_v33  ;;  %v2112_v0 = vadd.f32 1.0, %v4935_v27  ;;  %v2410_v43 = vsel %vm1994_vm14, %v4930_v47, %v2210_v5  ;;  %vm1989_vm2 = vcmp.gt.f32.partialorder %v4936_v48, 20.0 }
 0x3a2   : > { %vm2164_vm3 = vcmp.lt.f32.partialorder %v2163_v21, 0.0004427343  ;;  %v4937_v11 = vlaneseq  ;;  %2545 = vmatpush1.msra.mxu1 %v2410_v43  ;;  %v2152_v2 = vadd.f32 1.0, %v2151_v35  ;;  %v2154_v31 = vand.u32 2147483647, %v4928_v4 }
 0x3a3   : > { %v2986_v36 = vpop.eup %2985  ;;  %v2165_v38 = vsel %vm2164_vm3, %v2162_v20, %v2159_v6  ;;  %2995 = vlog2.f32 %v2112_v0  ;;  %v2180_v34 = vmul.f32 %v4924_v33, %v2179_v49  ;;  %v2170_v29 = vadd.f32 1.0, %v2169_v12  ;;  %v4949_v49 = vld [vmem:[#allocation19_spill] sm:$0xff]  ;;  %v4950_v0 = vld [vmem:[#allocation16_spill] sm:$0xff] }
 0x3a4   : > { %vm4490_vm4 = vcmp.lt.s32.totalorder %v4937_v11, 512  ;;  %v2405_v26 = vsel %vm1989_vm2, %v4936_v48, %v2165_v38  ;;  %v2177_v58 = vmul.f32 0.6931472, %v2986_v36  ;;  %vm1991_vm5 = vcmp.gt.f32.partialorder %v4940_v8, 20.0  ;;  %v2432_v48 = vld [vmem:[%s4614_s9] sm:$0x1] }
 0x3a5   : > { %2475 = vmatprep.subr.mxu0 %v2405_v26  ;;  %vm2182_vm6 = vcmp.lt.f32.partialorder %v2181_v24, 0.0004427343  ;;  %v2124_v54 = vmul.f32 -0.5, %v4933_v60  ;;  %v2130_v62 = vadd.f32 1.0, %v4941_v52  ;;  %v2172_v53 = vand.u32 2147483647, %v4929_v41 }
 0x3a6   : > { %v2988_v23 = vpop.eup %2987  ;;  %v2183_v44 = vsel %vm2182_vm6, %v2180_v34, %v2177_v58  ;;  %v2142_v46 = vmul.f32 -0.5, %v4934_v55  ;;  %v4945_v33 = vcombine.low %v4943_v17, %v4944_v7  ;;  %v2153_v37 = vmul.f32 %v4928_v4, %v2152_v2  ;;  %v4951_v2 = vld [vmem:[#allocation17_spill] sm:$0xff] }
 0x3a7   : > { %v2407_v47 = vsel %vm1991_vm5, %v4940_v8, %v2183_v44  ;;  %v2150_v39 = vmul.f32 0.6931472, %v2988_v23  ;;  %2997 = vlog2.f32 %v2130_v62  ;;  %vm1988_vm7 = vcmp.gt.f32.partialorder %v4946_v42, 20.0 }
 0x3a8   : > { %v1671_v50 = vrot.slane %v4945_v33, %v4942_v32  ;;  %v2990_v22 = vpop.eup %2989  ;;  %2546 = vmatprep.subr.mxu1 %v2407_v47  ;;  %vm2155_vm8 = vcmp.lt.f32.partialorder %v2154_v31, 0.0004427343  ;;  %v2171_v10 = vmul.f32 %v4929_v41, %v2170_v29  ;;  %v2125_v15 = vadd.f32 1.0, %v2124_v54 }
 0x3a9   : > { %v2156_v56 = vsel %vm2155_vm8, %v2153_v37, %v2150_v39  ;;  %v2168_v30 = vmul.f32 0.6931472, %v2990_v22  ;;  %v2115_v4 = vmul.f32 -0.5, %v4935_v27  ;;  %vm2173_vm9 = vcmp.lt.f32.partialorder %v2172_v53, 0.0004427343 }
 0x3aa   : > { %1677 = vst.msk [vmem:[%s4512_s23] sm:$0xf] %vm4490_vm4, %v1671_v50  ;;  %v2404_v19 = vsel %vm1988_vm7, %v4946_v42, %v2156_v56  ;;  %v2127_v13 = vand.u32 2147483647, %v4933_v60  ;;  %v2143_v14 = vadd.f32 1.0, %v2142_v46  ;;  %vm1990_vm10 = vcmp.gt.f32.partialorder %v4947_v3, 20.0 }
 0x3ab   : > { %2476 = vmatpush1.msra.mxu0 %v2404_v19  ;;  %v2174_v41 = vsel %vm2173_vm9, %v2171_v10, %v2168_v30  ;;  %v2145_v1 = vand.u32 2147483647, %v4934_v55  ;;  %v2126_v51 = vmul.f32 %v4933_v60, %v2125_v15  ;;  %v2116_v57 = vadd.f32 1.0, %v2115_v4 }
 0x3ac   : > { %v2992_v16 = vpop.eup %2991  ;;  %v2406_v9 = vsel %vm1990_vm10, %v4947_v3, %v2174_v41  ;;  %v2133_v61 = vmul.f32 -0.5, %v4941_v52  ;;  %vm2128_vm11 = vcmp.lt.f32.partialorder %v2127_v13, 0.0004427343  ;;  %v2144_v25 = vmul.f32 %v4934_v55, %v2143_v14 }
 0x3ad   : > { %v2994_v63 = vpop.eup %2993  ;;  %2547 = vmatpush1.msra.mxu1 %v2406_v9  ;;  %v2123_v18 = vmul.f32 0.6931472, %v2992_v16  ;;  %v2118_v28 = vand.u32 2147483647, %v4935_v27  ;;  %vm1985_vm12 = vcmp.gt.f32.partialorder %v4948_v40, 20.0  ;;  %vm1987_vm14 = vcmp.gt.f32.partialorder %v4949_v49, 20.0 }
 0x3ae   : > { %v2141_v21 = vmul.f32 0.6931472, %v2994_v63  ;;  %vm2146_vm13 = vcmp.lt.f32.partialorder %v2145_v1, 0.0004427343  ;;  %v2117_v6 = vmul.f32 %v4935_v27, %v2116_v57  ;;  %v2134_v24 = vadd.f32 1.0, %v2133_v61 }
 0x3af   : > { %v2129_v35 = vsel %vm2128_vm11, %v2126_v51, %v2123_v18  ;;  %vm2119_vm15 = vcmp.lt.f32.partialorder %v2118_v28, 0.0004427343  ;;  %v2136_v55 = vand.u32 2147483647, %v4941_v52  ;;  %vm1984_vm0 = vcmp.gt.f32.partialorder %v4950_v0, 20.0 }
 0x3b0   : > { %v2996_v59 = vpop.eup %2995  ;;  %v2401_v20 = vsel %vm1985_vm12, %v4948_v40, %v2129_v35  ;;  %v2147_v12 = vsel %vm2146_vm13, %v2144_v25, %v2141_v21  ;;  %vm2443_vm1 = vcmask 523264   ;;  %v2135_v38 = vmul.f32 %v4941_v52, %v2134_v24 }
 0x3b1   : > { %2477 = vmatprep.subr.mxu0 %v2401_v20  ;;  %v2403_v60 = vsel %vm1987_vm14, %v4949_v49, %v2147_v12  ;;  %v2114_v5 = vmul.f32 0.6931472, %v2996_v59  ;;  %vm2137_vm2 = vcmp.lt.f32.partialorder %v2136_v55, 0.0004427343  ;;  %vm1986_vm3 = vcmp.gt.f32.partialorder %v4951_v2, 20.0 }
 0x3b2   : > { %2548 = vmatprep.subr.mxu1 %v2403_v60 }
 0x3b3   : > { %v2120_v43 = vsel %vm2119_vm15, %v2117_v6, %v2114_v5 }
 0x3b4   : > { %v2998_v11 = vpop.eup %2997  ;;  %v2400_v27 = vsel %vm1984_vm0, %v4950_v0, %v2120_v43 }
 0x3b5   : > { %2478 = vmatpush1.msra.mxu0 %v2400_v27  ;;  %v2132_v36 = vmul.f32 0.6931472, %v2998_v11 }
 0x3b6   : > { %2808 = vmatmul.mubr.msk.f32.vlgmr.msra.gmra.mxu0 %vm2443_vm1, %v2432_v48 }
 0x3b7   : > { %v2138_v31 = vsel %vm2137_vm2, %v2135_v38, %v2132_v36 }
 0x3b8   : > { %v2402_v26 = vsel %vm1986_vm3, %v4951_v2, %v2138_v31 }
 0x3b9   : > { %2549 = vmatpush1.msra.mxu1 %v2402_v26 }
 0x3ba   : > { %2809 = vmatmul.mubr.msk.f32.vlgmr.msra.gmra.mxu1 %vm2443_vm1, %v2432_v48 }
 0x3bb   : > { %3014 = shalt.err (!%p3011_p3)
}
 0x3bc   : > { %s3015_s1 = scalar_lea.hbm %s2637_s17, 64  ;;  %s3019_s19 = scalar_lea.hbm %s4615_s11, 128 }
 0x3bd   : > { %p3016_p4 = scmp.ne.s32.totalorder %s2637_s17, %s3015_s1  ;;  %p3020_p9 = scmp.lt.s32.totalorder %s2637_s17, %s4615_s11 }
 0x3be   : > { %p3021_p10 = scmp.lt.s32.totalorder %s3019_s19, %s3015_s1 }
 0x3bf   : > { %p3017_p7 = pnand %p3016_p4, %p3207_p5 }
 0x3c0   : > { %p3022_p11 = por %p3021_p10, %p3020_p9 }
 0x3c1   : > { %p3018_p8 = pneg %p3017_p7 }
 0x3c3   : > { %p3023_p12 = pnand %p3022_p11, %p3018_p8 }
 0x3c5   : > { %3026 = shalt.err (!%p3023_p12)
}
 0x3c6   : > { %2820 = dma.vmem_to_hbm [thread:$0]  (%p3207_p5), %s2640_s20, 64, %s2637_s17, %s2620_s10   ;;  %v2437_v58 = vpop.permute.xlu1 %2436  ;;  %v4952_v29 = vld [vmem:[#allocation13_spill] sm:$0xff] }
 0x3c7   : > { %v4953_v8 = vsub.s32 0, %v4952_v29  ;;  %s4954_s0 = sshll.u32 %s4476_s21, 2  ;;  %s4955_s22 = sshll.u32 %s3190_s6, 6 }
 0x3c8   : > { %s422_s1 = scalar_lea.vmem [#allocation6], %s4954_s0  ;;  %s2651_s20 = scalar_lea.hbm %s4616_s12, %s4955_s22 }
 0x3c9   : > { %v2442_v54 = vrot.slane %v2437_v58, %v4953_v8  ;;  %s2653_s2 = sshll.u32 %s422_s1, 4  ;;  %s2625_s10 = scalar_lea.sflag [#allocation7], %s4476_s21  ;;  %s2654_s2 = int_to_ptr.vmem [resolvable:$true] %s2653_s2 }
 0x3ca   : > { %s3027_s24 = scalar_lea.vmem %s2654_s2, 64  ;;  %s3097_s30 = smov [#allocation6]  }
 0x3cb   : > { %p3028_p13 = scmp.ne.s32.totalorder %s2654_s2, %s3027_s24  ;;  %s3031_s23 = sshll.u32 %s3097_s30, 4  ;;  %s3032_s23 = int_to_ptr.vmem [resolvable:$false] %s3031_s23 }
 0x3cc   : > { %s3033_s18 = scalar_lea.vmem %s3032_s23, 128  ;;  %p3034_p2 = scmp.lt.s32.totalorder %s2654_s2, %s3032_s23 }
 0x3cd   : > { %p3029_p0 = pnand %p3028_p13, %p3207_p5  ;;  %p3035_p3 = scmp.lt.s32.totalorder %s3033_s18, %s3027_s24 }
 0x3cf   : > { %p3030_p1 = pneg %p3029_p0  ;;  %p3036_p4 = por %p3035_p3, %p3034_p2 }
 0x3d1   : > { %p3037_p7 = pnand %p3036_p4, %p3030_p1 }
 0x476   : > { %v2513_v34 = vpop.f32.mrf.mxu0 }
 0x477   : > { %v2514_v62 = vadd.f32 %v2513_v34, %v2442_v54 }
 0x478   : > { %v2515_v52 = vpop.f32.mrf.mxu0 }
 0x479   : > { %v2516_v23 = vadd.f32 %v2515_v52, %v2442_v54 }
 0x47a   : > { %v2584_v44 = vpop.f32.mrf.mxu1 }
 0x47b   : > { %v2593_v53 = vcombine.low %v2514_v62, %v2516_v23  ;;  %v2585_v17 = vadd.f32 %v2584_v44, %v2442_v54 }
 0x47c   : > { %v2586_v46 = vpop.f32.mrf.mxu1 }
 0x47d   : > { %v2587_v7 = vadd.f32 %v2586_v46, %v2442_v54  ;;  %v2601_v33 = vrot.slane %v2593_v53, %v4942_v32 }
 0x47f   : > { %v2594_v50 = vcombine.low %v2585_v17, %v2587_v7 }
 0x481   : > { %v2608_v47 = vrot.slane %v2594_v50, %v4942_v32 }
 0x483   : > { %v2609_v39 = vcombine.low %v2601_v33, %v2608_v47 }
 0x485   : > { %v2616_v37 = vrot.slane %v2609_v39, %v4942_v32 }
 0x487   : > { %2618 = vst.msk [vmem:[%s422_s1] sm:$0xf] %vm4490_vm4, %v2616_v37 }
 0x488   : > { %3040 = shalt.err (!%p3037_p7)
}
 0x489   : > { %s3041_s6 = scalar_lea.hbm %s2651_s20, 64  ;;  %s3045_s0 = scalar_lea.hbm %s4616_s12, 128 }
 0x48a   : > { %p3042_p8 = scmp.ne.s32.totalorder %s2651_s20, %s3041_s6  ;;  %p3046_p11 = scmp.lt.s32.totalorder %s2651_s20, %s4616_s12 }
 0x48b   : > { %p3047_p12 = scmp.lt.s32.totalorder %s3045_s0, %s3041_s6 }
 0x48c   : > { %p3043_p9 = pnand %p3042_p8, %p3207_p5 }
 0x48d   : > { %p3048_p13 = por %p3047_p12, %p3046_p11 }
 0x48e   : > { %p3044_p10 = pneg %p3043_p9 }
 0x490   : > { %p3049_p0 = pnand %p3048_p13, %p3044_p10 }
 0x492   : > { %3052 = shalt.err (!%p3049_p0)
}
 0x493   : > { %2821 = dma.vmem_to_hbm [thread:$0]  (%p3207_p5), %s2654_s2, 64, %s2651_s20, %s2625_s10  }
 0x494 PF: > { %p2831_p1 = scmp.ge.s32.totalorder %s3091_s28, 2  ;;  %s2665_s13 = sand.u32 1, %s3079_s25  }
 0x495   : > { %s2666_s17 = scalar_lea.sflag [#allocation5], %s2665_s13 }
 0x496   : > { %p2825_p2 = pnand %p2831_p1, %p3211_p6 }
 0x498   : > { %p2826_p3 = pneg %p2825_p2 }
 0x49a   : > { %3070 = dma.done.wait (%p2826_p3), %s2666_s17, 64  }
 0x49b   : > { %3072 = vsyncadd (%p2826_p3), %s2666_s17, 4294967232  ;;  %s2675_s24 = scalar_lea.sflag [#allocation7], %s2665_s13 }
 0x49c   : > { %3074 = dma.done.wait (%p2826_p3), %s2675_s24, 64  }
 0x49d   : > { %3076 = vsyncadd (%p2826_p3), %s2675_s24, 4294967232  ;;  %p30_p5 = scmp.ge.s32.totalorder %s3194_s29, 4   ;;  %s4956_s25 = smov %s3083_s26 }
 0x49e   : > { %s4957_s26 = smov %s3087_s27  ;;  %s4958_s27 = smov %s3205_s14 }
 0x49f   : > { %s4959_s28 = smov %s3194_s29  ;;  %32 = sbr.rel (!%p30_p5) target bundleno = 9 (0x9), region = 116 }
 0x4a4   :  { %2680 = vsyncpa [#allocation5], 1 }
 0x4a5   :  { %2682 = vsyncpa [#allocation5 + $0x1], 1 }
 0x4a6   :  { %2683 = vsyncpa [#allocation7], 1 }
 0x4a7   :  { %2685 = vsyncpa [#allocation7 + $0x1], 1 }

</bundles_post_ra>
